<compile_context>
chip_gen: v6e
topology: v6e:2x2x1
jax: 0.10.0
libtpu: 0.0.40
codegen_flags: <defaults>
</compile_context>

<pallas_src>
import jax
import jax.numpy as jnp
from jax import lax
from jax.experimental import pallas as pl
from jax.experimental.pallas import tpu as pltpu

NEG_SLOPE = 0.01  # nn.LeakyReLU() default negative_slope


def _leaky_relu(x):
    return jnp.where(x > 0, x, NEG_SLOPE * x)


def _round_up(x, m):
    return ((x + m - 1) // m) * m


def siamese_kernel(x1_ref, x2_ref,                 # (TILE_B, F) f32 each
                   wb_ref, bb_ref,                 # base model: (F,512) bf16, (1,512) f32
                   w1a_ref, w1b_ref, b1_ref,       # classifier L1 split: (512,512)x2 bf16, (1,512) f32
                   w2_ref, b2_ref,                 # classifier L2: (512,256) bf16, (1,256) f32
                   w3t_ref, b3_ref,                # classifier L3: (1,256) bf16, (1,1) f32
                   out_ref):                       # (1, TILE_B) f32, lane-dense
    f32, bf16 = jnp.float32, jnp.bfloat16
    tile_b = x1_ref.shape[0]

    # In-kernel f32->bf16 cast + batch-axis stack: one base-model dot per step
    # (single MXU weight pass for wb instead of two).  tile_b is always a
    # multiple of 16, so the sublane concat / slices below are tile-aligned.
    x = jnp.concatenate(
        [x1_ref[...].astype(bf16), x2_ref[...].astype(bf16)], axis=0)  # (2*TILE_B, F)

    e = _leaky_relu(
        jnp.dot(x, wb_ref[...], preferred_element_type=f32) + bb_ref[...])
    eb = e.astype(bf16)
    e1, e2 = eb[:tile_b], eb[tile_b:]

    # torch.cat((e1, e2), dim=1) @ W1 without materializing the concat.
    h1 = _leaky_relu(
        jnp.dot(e1, w1a_ref[...], preferred_element_type=f32)
        + jnp.dot(e2, w1b_ref[...], preferred_element_type=f32)
        + b1_ref[...])

    # Classifier L2.
    h2 = _leaky_relu(
        jnp.dot(h1.astype(bf16), w2_ref[...], preferred_element_type=f32)
        + b2_ref[...])

    # Classifier L3 (Linear(256, 1)) as (1,256) @ (TILE_B,256)^T -> (1, TILE_B),
    # lane-dense output block -> unmasked vector stores.
    logits = lax.dot_general(
        w3t_ref[...], h2.astype(bf16),
        dimension_numbers=(((1,), (1,)), ((), ())),
        preferred_element_type=f32)
    out_ref[...] = logits + b3_ref[...]


def init_params(key, feat_dim):
    ks = jax.random.split(key, 8)

    def lin(kw, kb, fan_in, fan_out):
        bound = 1.0 / jnp.sqrt(fan_in)
        w = jax.random.uniform(kw, (fan_in, fan_out), jnp.float32, -bound, bound)
        b = jax.random.uniform(kb, (1, fan_out), jnp.float32, -bound, bound)
        return w, b

    wb, bb = lin(ks[0], ks[1], feat_dim, 512)   # synthetic base model
    w1, b1 = lin(ks[2], ks[3], 1024, 512)       # classifier layer 1
    w2, b2 = lin(ks[4], ks[5], 512, 256)        # classifier layer 2
    w3, b3 = lin(ks[6], ks[7], 256, 1)          # classifier layer 3
    return (wb, bb, w1, b1, w2, b2, w3, b3)


def _pick_tile_b(b_padded):
    # Single large tile when it fits; otherwise >=2 tiles of <=512 rows so the
    # "parallel" batch axis shards across both v7x TensorCores while staying
    # comfortably inside VMEM on every generation.
    if b_padded <= 512:
        return b_padded
    return min(512, _round_up((b_padded + 1) // 2, 256))


@jax.jit
def siamese_forward(image1, image2, params):
    wb, bb, w1, b1, w2, b2, w3, b3 = params
    B = image1.shape[0]
    F = wb.shape[0]
    f32, bf16 = jnp.float32, jnp.bfloat16

    # NCHW -> (B, F) flatten is free (contiguous reshape); no wrapper-side cast.
    x1 = image1.reshape(B, F).astype(f32)
    x2 = image2.reshape(B, F).astype(f32)

    # Pad batch to a multiple of 16 so every tile / in-kernel concat boundary is
    # aligned to native (16,128)/(8,128) tiling.  Padded rows are sliced off.
    Bp = max(_round_up(B, 16), 16)
    if Bp != B:
        x1 = jnp.pad(x1, ((0, Bp - B), (0, 0)))
        x2 = jnp.pad(x2, ((0, Bp - B), (0, 0)))

    tile_b = _pick_tile_b(Bp)
    num_tiles = pl.cdiv(Bp, tile_b)
    out_w = num_tiles * tile_b

    wb_bf = wb.astype(bf16)
    w1a = w1[:512].astype(bf16)       # multiplies e1 (first half of the concat)
    w1b = w1[512:].astype(bf16)       # multiplies e2 (second half of the concat)
    w2_bf = w2.astype(bf16)
    w3t = w3.T.astype(bf16)           # (1, 256)
    weights = (wb_bf, bb, w1a, w1b, b1, w2_bf, b2, w3t, b3)

    x_spec = pl.BlockSpec((tile_b, F), lambda i: (i, 0))
    # Constant index_map -> DMA'd exactly once and VMEM-resident; single-buffered.
    resident = lambda a: pl.BlockSpec(tuple(a.shape), lambda i: (0, 0),
                                      pipeline_mode=pl.Buffered(1))

    weight_bytes = sum(int(a.size) * a.dtype.itemsize for a in weights)
    flops = 2 * Bp * (2 * F * 512 + 1024 * 512 + 512 * 256 + 256)
    bytes_accessed = 2 * Bp * F * 4 + weight_bytes + out_w * 4

    # VMEM estimate: double-buffered f32 input tiles + resident weights +
    # per-step activations (stacked bf16 x, e/h1/h2 in f32 and bf16).
    vmem_est = (weight_bytes
                + 2 * 2 * tile_b * F * 4
                + 2 * tile_b * (F * 2 + 512 * 4 + 512 * 2 + 512 * 4 + 512 * 2 + 256 * 4))
    vmem_limit = int(min(48 * 1024 * 1024, max(2 * vmem_est, 32 * 1024 * 1024)))

    out = pl.pallas_call(
        siamese_kernel,
        out_shape=jax.ShapeDtypeStruct((1, out_w), f32),
        grid=(num_tiles,),
        in_specs=[x_spec, x_spec] + [resident(a) for a in weights],
        out_specs=pl.BlockSpec((1, tile_b), lambda i: (0, i)),
        compiler_params=pltpu.CompilerParams(
            dimension_semantics=("parallel",),
            vmem_limit_bytes=vmem_limit,
        ),
        cost_estimate=pl.CostEstimate(
            flops=flops, transcendentals=0, bytes_accessed=bytes_accessed),
    )(x1, x2, *weights)

    # Undo lane-dense packing and batch padding -> (B, 1).
    return out[0, :B].reshape(B, 1)


def reference_forward(image1, image2, params):
    """Pure-JAX reference mirroring the kernel's bf16-matmul / f32-accumulate math."""
    wb, bb, w1, b1, w2, b2, w3, b3 = params
    B = image1.shape[0]
    bf16, f32 = jnp.bfloat16, jnp.float32

    def mm(a, b):
        return jnp.dot(a.astype(bf16), b.astype(bf16), preferred_element_type=f32)

    lrelu = lambda x: jnp.where(x > 0, x, NEG_SLOPE * x)
    x1 = image1.reshape(B, -1)
    x2 = image2.reshape(B, -1)
    e1 = lrelu(mm(x1, wb) + bb)
    e2 = lrelu(mm(x2, wb) + bb)
    combined = jnp.concatenate([e1, e2], axis=1)
    h1 = lrelu(mm(combined, w1) + b1)
    h2 = lrelu(mm(h1, w2) + b2)
    return mm(h2, w3) + b3


if __name__ == "__main__":
    key = jax.random.PRNGKey(0)
    k_img1, k_img2, k_params = jax.random.split(key, 3)

    B, C, H, W = 2, 4, 16, 16          # feat_dim = 4*16*16 = 1024
    image1 = jax.random.normal(k_img1, (B, C, H, W), jnp.float32)
    image2 = jax.random.normal(k_img2, (B, C, H, W), jnp.float32)

    params = init_params(k_params, C * H * W)

    out = siamese_forward(image1, image2, params)
    jax.block_until_ready(out)

    ref = reference_forward(image1, image2, params)
    assert out.shape == (B, 1)
    assert jnp.allclose(out, ref, atol=2e-3, rtol=2e-3)

    print("KERNEL_OK")
</pallas_src>

<mosaic_0001>
module attributes {stable_mosaic.version = 11 : i64} {
  func.func @siamese_kernel(%arg0: i32, %arg1: memref<16x1024xf32, #tpu.memory_space<vmem>>, %arg2: memref<16x1024xf32, #tpu.memory_space<vmem>>, %arg3: memref<1024x512xbf16, #tpu.memory_space<vmem>>, %arg4: memref<1x512xf32, #tpu.memory_space<vmem>>, %arg5: memref<512x512xbf16, #tpu.memory_space<vmem>>, %arg6: memref<512x512xbf16, #tpu.memory_space<vmem>>, %arg7: memref<1x512xf32, #tpu.memory_space<vmem>>, %arg8: memref<512x256xbf16, #tpu.memory_space<vmem>>, %arg9: memref<1x256xf32, #tpu.memory_space<vmem>>, %arg10: memref<1x256xbf16, #tpu.memory_space<vmem>>, %arg11: memref<1x1xf32, #tpu.memory_space<vmem>>, %arg12: memref<1x16xf32, #tpu.memory_space<vmem>>) attributes {dimension_semantics = [#tpu.dimension_semantics<parallel>], iteration_bounds = array<i64: 1>, scalar_prefetch = 0 : i64, scratch_operands = 0 : i64, tpu.core_type = #tpu.core_type<tc>, window_params = [{transform_indices = @transform_0, window_bounds = array<i64: 16, 1024>}, {transform_indices = @transform_1, window_bounds = array<i64: 16, 1024>}, {pipeline_mode = #tpu.pipeline_mode<synchronous>, transform_indices = @transform_2, window_bounds = array<i64: 1024, 512>}, {pipeline_mode = #tpu.pipeline_mode<synchronous>, transform_indices = @transform_3, window_bounds = array<i64: 1, 512>}, {pipeline_mode = #tpu.pipeline_mode<synchronous>, transform_indices = @transform_4, window_bounds = array<i64: 512, 512>}, {pipeline_mode = #tpu.pipeline_mode<synchronous>, transform_indices = @transform_5, window_bounds = array<i64: 512, 512>}, {pipeline_mode = #tpu.pipeline_mode<synchronous>, transform_indices = @transform_6, window_bounds = array<i64: 1, 512>}, {pipeline_mode = #tpu.pipeline_mode<synchronous>, transform_indices = @transform_7, window_bounds = array<i64: 512, 256>}, {pipeline_mode = #tpu.pipeline_mode<synchronous>, transform_indices = @transform_8, window_bounds = array<i64: 1, 256>}, {pipeline_mode = #tpu.pipeline_mode<synchronous>, transform_indices = @transform_9, window_bounds = array<i64: 1, 256>}, {pipeline_mode = #tpu.pipeline_mode<synchronous>, transform_indices = @transform_10, window_bounds = array<i64: 1, 1>}, {transform_indices = @transform_11, window_bounds = array<i64: 1, 16>}]} {
    %c0 = arith.constant 0 : index
    %c0_0 = arith.constant 0 : index
    %0 = vector.load %arg1[%c0, %c0_0] : memref<16x1024xf32, #tpu.memory_space<vmem>>, vector<16x1024xf32>
    %1 = arith.truncf %0 : vector<16x1024xf32> to vector<16x1024xbf16>
    %c0_1 = arith.constant 0 : index
    %c0_2 = arith.constant 0 : index
    %2 = vector.load %arg2[%c0_1, %c0_2] : memref<16x1024xf32, #tpu.memory_space<vmem>>, vector<16x1024xf32>
    %3 = arith.truncf %2 : vector<16x1024xf32> to vector<16x1024xbf16>
    %4 = tpu.concatenate %1, %3 in 0 : vector<16x1024xbf16>, vector<16x1024xbf16> -> vector<32x1024xbf16>
    %c0_3 = arith.constant 0 : index
    %c0_4 = arith.constant 0 : index
    %5 = vector.load %arg3[%c0_3, %c0_4] : memref<1024x512xbf16, #tpu.memory_space<vmem>>, vector<1024x512xbf16>
    %cst = arith.constant dense<0.000000e+00> : vector<32x512xf32>
    %6 = tpu.matmul %4, %5, %cst {dimension_numbers = #tpu.dot_dimension_numbers<[1], [0], [0], [1], [0, 0, 1, 1], [], []>} : vector<32x1024xbf16>, vector<1024x512xbf16>, vector<32x512xf32> -> vector<32x512xf32>
    %c0_5 = arith.constant 0 : index
    %c0_6 = arith.constant 0 : index
    %7 = vector.load %arg4[%c0_5, %c0_6] : memref<1x512xf32, #tpu.memory_space<vmem>>, vector<1x512xf32>
    %8 = vector.broadcast %7 : vector<1x512xf32> to vector<32x512xf32>
    %9 = arith.addf %6, %8 : vector<32x512xf32>
    %cst_7 = arith.constant 0.000000e+00 : f32
    %10 = vector.broadcast %cst_7 : f32 to vector<32x512xf32>
    %11 = arith.cmpf ogt, %9, %10 : vector<32x512xf32>
    %cst_8 = arith.constant 0.00999999977 : f32
    %12 = vector.broadcast %cst_8 : f32 to vector<32x512xf32>
    %13 = arith.mulf %12, %9 : vector<32x512xf32>
    %14 = arith.select %11, %9, %13 : vector<32x512xi1>, vector<32x512xf32>
    %15 = arith.truncf %14 : vector<32x512xf32> to vector<32x512xbf16>
    %16 = vector.extract_strided_slice %15 {offsets = [0, 0], sizes = [16, 512], strides = [1, 1]} : vector<32x512xbf16> to vector<16x512xbf16>
    %17 = vector.extract_strided_slice %15 {offsets = [16, 0], sizes = [16, 512], strides = [1, 1]} : vector<32x512xbf16> to vector<16x512xbf16>
    %c0_9 = arith.constant 0 : index
    %c0_10 = arith.constant 0 : index
    %18 = vector.load %arg5[%c0_9, %c0_10] : memref<512x512xbf16, #tpu.memory_space<vmem>>, vector<512x512xbf16>
    %cst_11 = arith.constant dense<0.000000e+00> : vector<16x512xf32>
    %19 = tpu.matmul %16, %18, %cst_11 {dimension_numbers = #tpu.dot_dimension_numbers<[1], [0], [0], [1], [0, 0, 1, 1], [], []>} : vector<16x512xbf16>, vector<512x512xbf16>, vector<16x512xf32> -> vector<16x512xf32>
    %c0_12 = arith.constant 0 : index
    %c0_13 = arith.constant 0 : index
    %20 = vector.load %arg6[%c0_12, %c0_13] : memref<512x512xbf16, #tpu.memory_space<vmem>>, vector<512x512xbf16>
    %cst_14 = arith.constant dense<0.000000e+00> : vector<16x512xf32>
    %21 = tpu.matmul %17, %20, %cst_14 {dimension_numbers = #tpu.dot_dimension_numbers<[1], [0], [0], [1], [0, 0, 1, 1], [], []>} : vector<16x512xbf16>, vector<512x512xbf16>, vector<16x512xf32> -> vector<16x512xf32>
    %22 = arith.addf %19, %21 : vector<16x512xf32>
    %c0_15 = arith.constant 0 : index
    %c0_16 = arith.constant 0 : index
    %23 = vector.load %arg7[%c0_15, %c0_16] : memref<1x512xf32, #tpu.memory_space<vmem>>, vector<1x512xf32>
    %24 = vector.broadcast %23 : vector<1x512xf32> to vector<16x512xf32>
    %25 = arith.addf %22, %24 : vector<16x512xf32>
    %cst_17 = arith.constant 0.000000e+00 : f32
    %26 = vector.broadcast %cst_17 : f32 to vector<16x512xf32>
    %27 = arith.cmpf ogt, %25, %26 : vector<16x512xf32>
    %cst_18 = arith.constant 0.00999999977 : f32
    %28 = vector.broadcast %cst_18 : f32 to vector<16x512xf32>
    %29 = arith.mulf %28, %25 : vector<16x512xf32>
    %30 = arith.select %27, %25, %29 : vector<16x512xi1>, vector<16x512xf32>
    %31 = arith.truncf %30 : vector<16x512xf32> to vector<16x512xbf16>
    %c0_19 = arith.constant 0 : index
    %c0_20 = arith.constant 0 : index
    %32 = vector.load %arg8[%c0_19, %c0_20] : memref<512x256xbf16, #tpu.memory_space<vmem>>, vector<512x256xbf16>
    %cst_21 = arith.constant dense<0.000000e+00> : vector<16x256xf32>
    %33 = tpu.matmul %31, %32, %cst_21 {dimension_numbers = #tpu.dot_dimension_numbers<[1], [0], [0], [1], [0, 0, 1, 1], [], []>} : vector<16x512xbf16>, vector<512x256xbf16>, vector<16x256xf32> -> vector<16x256xf32>
    %c0_22 = arith.constant 0 : index
    %c0_23 = arith.constant 0 : index
    %34 = vector.load %arg9[%c0_22, %c0_23] : memref<1x256xf32, #tpu.memory_space<vmem>>, vector<1x256xf32>
    %35 = vector.broadcast %34 : vector<1x256xf32> to vector<16x256xf32>
    %36 = arith.addf %33, %35 : vector<16x256xf32>
    %cst_24 = arith.constant 0.000000e+00 : f32
    %37 = vector.broadcast %cst_24 : f32 to vector<16x256xf32>
    %38 = arith.cmpf ogt, %36, %37 : vector<16x256xf32>
    %cst_25 = arith.constant 0.00999999977 : f32
    %39 = vector.broadcast %cst_25 : f32 to vector<16x256xf32>
    %40 = arith.mulf %39, %36 : vector<16x256xf32>
    %41 = arith.select %38, %36, %40 : vector<16x256xi1>, vector<16x256xf32>
    %c0_26 = arith.constant 0 : index
    %c0_27 = arith.constant 0 : index
    %42 = vector.load %arg10[%c0_26, %c0_27] : memref<1x256xbf16, #tpu.memory_space<vmem>>, vector<1x256xbf16>
    %43 = arith.truncf %41 : vector<16x256xf32> to vector<16x256xbf16>
    %cst_28 = arith.constant dense<0.000000e+00> : vector<1x16xf32>
    %44 = tpu.matmul %42, %43, %cst_28 {dimension_numbers = #tpu.dot_dimension_numbers<[1], [1], [0], [0], [0, 0, 1, 0], [], []>} : vector<1x256xbf16>, vector<16x256xbf16>, vector<1x16xf32> -> vector<1x16xf32>
    %c0_29 = arith.constant 0 : index
    %c0_30 = arith.constant 0 : index
    %45 = vector.load %arg11[%c0_29, %c0_30] : memref<1x1xf32, #tpu.memory_space<vmem>>, vector<1x1xf32>
    %46 = vector.broadcast %45 : vector<1x1xf32> to vector<1x16xf32>
    %47 = arith.addf %44, %46 : vector<1x16xf32>
    %c0_31 = arith.constant 0 : index
    %c0_32 = arith.constant 0 : index
    %48 = vector.load %arg12[%c0_31, %c0_32] : memref<1x16xf32, #tpu.memory_space<vmem>>, vector<1x16xf32>
    tpu.vector_store %arg12[%c0_31, %c0_32], %47 {strides = array<i32>} : memref<1x16xf32, #tpu.memory_space<vmem>>, vector<1x16xf32>,
    return
  }
  func.func @transform_0(%arg0: i32) -> (i32, i32) {
    %c0_i32 = arith.constant 0 : i32
    %c0_i32_0 = arith.constant 0 : i32
    return %arg0, %c0_i32 : i32, i32
  }
  func.func @transform_1(%arg0: i32) -> (i32, i32) {
    %c0_i32 = arith.constant 0 : i32
    %c0_i32_0 = arith.constant 0 : i32
    return %arg0, %c0_i32 : i32, i32
  }
  func.func @transform_2(%arg0: i32) -> (i32, i32) {
    %c0_i32 = arith.constant 0 : i32
    %c0_i32_0 = arith.constant 0 : i32
    %c0_i32_1 = arith.constant 0 : i32
    return %c0_i32, %c0_i32_0 : i32, i32
  }
  func.func @transform_3(%arg0: i32) -> (i32, i32) {
    %c0_i32 = arith.constant 0 : i32
    %c0_i32_0 = arith.constant 0 : i32
    %c0_i32_1 = arith.constant 0 : i32
    return %c0_i32, %c0_i32_0 : i32, i32
  }
  func.func @transform_4(%arg0: i32) -> (i32, i32) {
    %c0_i32 = arith.constant 0 : i32
    %c0_i32_0 = arith.constant 0 : i32
    %c0_i32_1 = arith.constant 0 : i32
    return %c0_i32, %c0_i32_0 : i32, i32
  }
  func.func @transform_5(%arg0: i32) -> (i32, i32) {
    %c0_i32 = arith.constant 0 : i32
    %c0_i32_0 = arith.constant 0 : i32
    %c0_i32_1 = arith.constant 0 : i32
    return %c0_i32, %c0_i32_0 : i32, i32
  }
  func.func @transform_6(%arg0: i32) -> (i32, i32) {
    %c0_i32 = arith.constant 0 : i32
    %c0_i32_0 = arith.constant 0 : i32
    %c0_i32_1 = arith.constant 0 : i32
    return %c0_i32, %c0_i32_0 : i32, i32
  }
  func.func @transform_7(%arg0: i32) -> (i32, i32) {
    %c0_i32 = arith.constant 0 : i32
    %c0_i32_0 = arith.constant 0 : i32
    %c0_i32_1 = arith.constant 0 : i32
    return %c0_i32, %c0_i32_0 : i32, i32
  }
  func.func @transform_8(%arg0: i32) -> (i32, i32) {
    %c0_i32 = arith.constant 0 : i32
    %c0_i32_0 = arith.constant 0 : i32
    %c0_i32_1 = arith.constant 0 : i32
    return %c0_i32, %c0_i32_0 : i32, i32
  }
  func.func @transform_9(%arg0: i32) -> (i32, i32) {
    %c0_i32 = arith.constant 0 : i32
    %c0_i32_0 = arith.constant 0 : i32
    %c0_i32_1 = arith.constant 0 : i32
    return %c0_i32, %c0_i32_0 : i32, i32
  }
  func.func @transform_10(%arg0: i32) -> (i32, i32) {
    %c0_i32 = arith.constant 0 : i32
    %c0_i32_0 = arith.constant 0 : i32
    %c0_i32_1 = arith.constant 0 : i32
    return %c0_i32, %c0_i32_0 : i32, i32
  }
  func.func @transform_11(%arg0: i32) -> (i32, i32) {
    %c0_i32 = arith.constant 0 : i32
    %c0_i32_0 = arith.constant 0 : i32
    return %c0_i32, %arg0 : i32, i32
  }
}

</mosaic_0001>

<bundles_post_ra>
// kernel: siamese_forward.1
= control target key start
LH: loop header
LB: loop body
LE: loop exit
PB: predicated region body
PF: predicated region fallthrough
CT: control target
= control target key end

     0   :  { %s8162_s2 = inlined_call_operand.vmem [shape: bf16[1024,512], index: 2, kind: input, shape index: {}]   ;;  %s8163_s0 = inlined_call_operand.vmem [shape: f32[16,1024], index: 0, kind: input, shape index: {}]   ;;  %s8164_s1 = inlined_call_operand.vmem [shape: f32[16,1024], index: 1, kind: input, shape index: {}]   ;;  %s8165_s5 = inlined_call_operand.vmem [shape: bf16[512,512], index: 5, kind: input, shape index: {}]   ;;  %s8166_s3 = inlined_call_operand.vmem [shape: f32[1,512], index: 3, kind: input, shape index: {}]   ;;  %s8167_s4 = inlined_call_operand.vmem [shape: bf16[512,512], index: 4, kind: input, shape index: {}]   ;;  %s8168_s7 = inlined_call_operand.vmem [shape: bf16[512,256], index: 7, kind: input, shape index: {}]   ;;  %s8169_s6 = inlined_call_operand.vmem [shape: f32[1,512], index: 6, kind: input, shape index: {}]   ;;  %s8170_s9 = inlined_call_operand.vmem [shape: bf16[1,256], index: 9, kind: input, shape index: {}]   ;;  %s8171_s10 = inlined_call_operand.<no memory space> [shape: f32[1,1], index: 10, kind: input, shape index: {}]   ;;  %s8172_s8 = inlined_call_operand.vmem [shape: f32[1,256], index: 8, kind: input, shape index: {}]   ;;  %s8173_s11 = inlined_call_operand.vmem [shape: f32[1,16], index: 11, kind: output, shape index: {}]  }
   0x1   :  { %v5223_v0 = vld [vmem:[%s8162_s2 + $0xe4] ss:$16 sps:$4 sm:$0xff]   ;;  %v5227_v2 = vld [vmem:[%s8162_s2 + $0xe0] ss:$16 sps:$4 sm:$0xff]   ;;  %v42_v46 = vld [vmem:[%s8163_s0 + $0x8] sm:$0xff] }
   0x2   :  { %v5225_v1 = vld [vmem:[%s8162_s2 + $0x2e4] ss:$16 sps:$4 sm:$0xff]   ;;  %1647 = vmatprep.subr.bf16.mxu0 %v5223_v0  ;;  %v5228_v3 = vld [vmem:[%s8162_s2 + $0x2e0] ss:$16 sps:$4 sm:$0xff]   ;;  %v50_v47 = vld [vmem:[%s8163_s0 + $0x48] sm:$0xff] }
   0x3   :  { %1700 = vmatprep.subr.bf16.mxu1 %v5225_v1  ;;  %v5229_v4 = vld [vmem:[%s8162_s2 + $0xc4] ss:$16 sps:$4 sm:$0xff]   ;;  %1648 = vmatpush1.bf16.msra.mxu0 %v5227_v2  ;;  %v5233_v6 = vld [vmem:[%s8162_s2 + $0xc0] ss:$16 sps:$4 sm:$0xff]   ;;  %v44_v48 = vld [vmem:[%s8163_s0 + $0x18] sm:$0xff]  ;;  %v6308_v53 = vpack.c.bf16 %v50_v47, %v42_v46 }
   0x4   :  { %1701 = vmatpush1.bf16.msra.mxu1 %v5228_v3  ;;  %v5231_v5 = vld [vmem:[%s8162_s2 + $0x2c4] ss:$16 sps:$4 sm:$0xff]   ;;  %1649 = vmatprep.subr.bf16.mxu0 %v5229_v4  ;;  %v5234_v7 = vld [vmem:[%s8162_s2 + $0x2c0] ss:$16 sps:$4 sm:$0xff]   ;;  %v52_v49 = vld [vmem:[%s8163_s0 + $0x58] sm:$0xff] }
   0x5   :  { %1702 = vmatprep.subr.bf16.mxu1 %v5231_v5  ;;  %v5235_v8 = vld [vmem:[%s8162_s2 + $0xa4] ss:$16 sps:$4 sm:$0xff]   ;;  %v5239_v10 = vld [vmem:[%s8162_s2 + $0xa0] ss:$16 sps:$4 sm:$0xff]   ;;  %v6310_v54 = vpack.c.bf16 %v52_v49, %v44_v48  ;;  %1679 = vmatprep.mubr.bf16.mxu0 %v6308_v53 }
   0x6   :  { %v5237_v9 = vld [vmem:[%s8162_s2 + $0x2a4] ss:$16 sps:$4 sm:$0xff]   ;;  %v5240_v11 = vld [vmem:[%s8162_s2 + $0x2a0] ss:$16 sps:$4 sm:$0xff]  }
   0x7   :  { %1650 = vmatpush1.bf16.msra.mxu0 %v5233_v6  ;;  %v5241_v12 = vld [vmem:[%s8162_s2 + $0x84] ss:$16 sps:$4 sm:$0xff]   ;;  %v5245_v14 = vld [vmem:[%s8162_s2 + $0x80] ss:$16 sps:$4 sm:$0xff]   ;;  %1732 = vmatprep.mubr.bf16.mxu1 %v6310_v54 }
   0x8   :  { %1703 = vmatpush1.bf16.msra.mxu1 %v5234_v7  ;;  %1651 = vmatprep.subr.bf16.mxu0 %v5235_v8  ;;  %v5243_v13 = vld [vmem:[%s8162_s2 + $0x284] ss:$16 sps:$4 sm:$0xff]   ;;  %v5246_v15 = vld [vmem:[%s8162_s2 + $0x280] ss:$16 sps:$4 sm:$0xff]  }
   0x9   :  { %1704 = vmatprep.subr.bf16.mxu1 %v5237_v9  ;;  %v5247_v16 = vld [vmem:[%s8162_s2 + $0x64] ss:$16 sps:$4 sm:$0xff]   ;;  %v5251_v18 = vld [vmem:[%s8162_s2 + $0x60] ss:$16 sps:$4 sm:$0xff]  }
   0xa   :  { %v5249_v17 = vld [vmem:[%s8162_s2 + $0x264] ss:$16 sps:$4 sm:$0xff]   ;;  %v5252_v19 = vld [vmem:[%s8162_s2 + $0x260] ss:$16 sps:$4 sm:$0xff]  }
   0xb   :  { %1652 = vmatpush1.bf16.msra.mxu0 %v5239_v10  ;;  %v5253_v20 = vld [vmem:[%s8162_s2 + $0x44] ss:$16 sps:$4 sm:$0xff]   ;;  %v5257_v22 = vld [vmem:[%s8162_s2 + $0x40] ss:$16 sps:$4 sm:$0xff]  }
   0xc   :  { %1705 = vmatpush1.bf16.msra.mxu1 %v5240_v11  ;;  %1653 = vmatprep.subr.bf16.mxu0 %v5241_v12  ;;  %v5255_v21 = vld [vmem:[%s8162_s2 + $0x244] ss:$16 sps:$4 sm:$0xff]   ;;  %v5258_v23 = vld [vmem:[%s8162_s2 + $0x240] ss:$16 sps:$4 sm:$0xff]  }
   0xd   :  { %1706 = vmatprep.subr.bf16.mxu1 %v5243_v13  ;;  %v5259_v24 = vld [vmem:[%s8162_s2 + $0x24] ss:$16 sps:$4 sm:$0xff]   ;;  %v5263_v26 = vld [vmem:[%s8162_s2 + $0x20] ss:$16 sps:$4 sm:$0xff]  }
   0xe   :  { %v5261_v25 = vld [vmem:[%s8162_s2 + $0x224] ss:$16 sps:$4 sm:$0xff]   ;;  %v5264_v27 = vld [vmem:[%s8162_s2 + $0x220] ss:$16 sps:$4 sm:$0xff]  }
   0xf   :  { %1654 = vmatpush1.bf16.msra.mxu0 %v5245_v14  ;;  %v5265_v28 = vld [vmem:[%s8162_s2 + $0x4] ss:$16 sps:$4 sm:$0xff]   ;;  %v5269_v30 = vld [vmem:[%s8162_s2] ss:$16 sps:$4 sm:$0xff]  }
  0x10   :  { %1707 = vmatpush1.bf16.msra.mxu1 %v5246_v15  ;;  %1655 = vmatprep.subr.bf16.mxu0 %v5247_v16  ;;  %v5267_v29 = vld [vmem:[%s8162_s2 + $0x204] ss:$16 sps:$4 sm:$0xff]   ;;  %v5270_v31 = vld [vmem:[%s8162_s2 + $0x200] ss:$16 sps:$4 sm:$0xff]  }
  0x11   :  { %1708 = vmatprep.subr.bf16.mxu1 %v5249_v17  ;;  %v5271_v32 = vld [vmem:[%s8162_s2 + $0x1e4] ss:$16 sps:$4 sm:$0xff]   ;;  %v5275_v34 = vld [vmem:[%s8162_s2 + $0x1e0] ss:$16 sps:$4 sm:$0xff]  }
  0x12   :  { %v5273_v33 = vld [vmem:[%s8162_s2 + $0x3e4] ss:$16 sps:$4 sm:$0xff]   ;;  %v5276_v35 = vld [vmem:[%s8162_s2 + $0x3e0] ss:$16 sps:$4 sm:$0xff]  }
  0x13   :  { %1656 = vmatpush1.bf16.msra.mxu0 %v5251_v18  ;;  %v5277_v36 = vld [vmem:[%s8162_s2 + $0x1c4] ss:$16 sps:$4 sm:$0xff]   ;;  %v5281_v38 = vld [vmem:[%s8162_s2 + $0x1c0] ss:$16 sps:$4 sm:$0xff]  }
  0x14   :  { %1709 = vmatpush1.bf16.msra.mxu1 %v5252_v19  ;;  %1657 = vmatprep.subr.bf16.mxu0 %v5253_v20  ;;  %v5279_v37 = vld [vmem:[%s8162_s2 + $0x3c4] ss:$16 sps:$4 sm:$0xff]   ;;  %v5282_v39 = vld [vmem:[%s8162_s2 + $0x3c0] ss:$16 sps:$4 sm:$0xff]  }
  0x15   :  { %1710 = vmatprep.subr.bf16.mxu1 %v5255_v21  ;;  %v5283_v40 = vld [vmem:[%s8162_s2 + $0x1a4] ss:$16 sps:$4 sm:$0xff]   ;;  %v5287_v42 = vld [vmem:[%s8162_s2 + $0x1a0] ss:$16 sps:$4 sm:$0xff]  }
  0x16   :  { %v5285_v41 = vld [vmem:[%s8162_s2 + $0x3a4] ss:$16 sps:$4 sm:$0xff]   ;;  %v5288_v43 = vld [vmem:[%s8162_s2 + $0x3a0] ss:$16 sps:$4 sm:$0xff]  }
  0x17   :  { %1658 = vmatpush1.bf16.msra.mxu0 %v5257_v22  ;;  %v5289_v44 = vld [vmem:[%s8162_s2 + $0x184] ss:$16 sps:$4 sm:$0xff]   ;;  %v5293_v50 = vld [vmem:[%s8162_s2 + $0x180] ss:$16 sps:$4 sm:$0xff]  }
  0x18   :  { %1711 = vmatpush1.bf16.msra.mxu1 %v5258_v23  ;;  %1659 = vmatprep.subr.bf16.mxu0 %v5259_v24  ;;  %v5291_v45 = vld [vmem:[%s8162_s2 + $0x384] ss:$16 sps:$4 sm:$0xff]   ;;  %v5294_v51 = vld [vmem:[%s8162_s2 + $0x380] ss:$16 sps:$4 sm:$0xff]  }
  0x19   :  { %1712 = vmatprep.subr.bf16.mxu1 %v5261_v25  ;;  %v5295_v52 = vld [vmem:[%s8162_s2 + $0x164] ss:$16 sps:$4 sm:$0xff]   ;;  %v5299_v56 = vld [vmem:[%s8162_s2 + $0x160] ss:$16 sps:$4 sm:$0xff]  }
  0x1a   :  { %v5297_v55 = vld [vmem:[%s8162_s2 + $0x364] ss:$16 sps:$4 sm:$0xff]   ;;  %v5300_v57 = vld [vmem:[%s8162_s2 + $0x360] ss:$16 sps:$4 sm:$0xff]  }
  0x1b   :  { %1660 = vmatpush1.bf16.msra.mxu0 %v5263_v26  ;;  %v5301_v58 = vld [vmem:[%s8162_s2 + $0x144] ss:$16 sps:$4 sm:$0xff]   ;;  %v5305_v60 = vld [vmem:[%s8162_s2 + $0x140] ss:$16 sps:$4 sm:$0xff]  }
  0x1c   :  { %1713 = vmatpush1.bf16.msra.mxu1 %v5264_v27  ;;  %1661 = vmatprep.subr.bf16.mxu0 %v5265_v28  ;;  %v5303_v59 = vld [vmem:[%s8162_s2 + $0x344] ss:$16 sps:$4 sm:$0xff]   ;;  %v5306_v61 = vld [vmem:[%s8162_s2 + $0x340] ss:$16 sps:$4 sm:$0xff]  }
  0x1d   :  { %1714 = vmatprep.subr.bf16.mxu1 %v5267_v29  ;;  %v5307_v62 = vld [vmem:[%s8162_s2 + $0x124] ss:$16 sps:$4 sm:$0xff]   ;;  %v5311_v0 = vld [vmem:[%s8162_s2 + $0x120] ss:$16 sps:$4 sm:$0xff]  }
  0x1e   :  { %v5309_v63 = vld [vmem:[%s8162_s2 + $0x324] ss:$16 sps:$4 sm:$0xff]   ;;  %v5312_v1 = vld [vmem:[%s8162_s2 + $0x320] ss:$16 sps:$4 sm:$0xff]  }
  0x1f   :  { %1662 = vmatpush1.bf16.msra.mxu0 %v5269_v30  ;;  %v5313_v2 = vld [vmem:[%s8162_s2 + $0x104] ss:$16 sps:$4 sm:$0xff]   ;;  %v5317_v4 = vld [vmem:[%s8162_s2 + $0x100] ss:$16 sps:$4 sm:$0xff]  }
  0x20   :  { %1715 = vmatpush1.bf16.msra.mxu1 %v5270_v31  ;;  %1663 = vmatprep.subr.bf16.mxu0 %v5271_v32  ;;  %v5315_v3 = vld [vmem:[%s8162_s2 + $0x304] ss:$16 sps:$4 sm:$0xff]   ;;  %v5318_v5 = vld [vmem:[%s8162_s2 + $0x300] ss:$16 sps:$4 sm:$0xff]  }
  0x21   :  { %1716 = vmatprep.subr.bf16.mxu1 %v5273_v33  ;;  %v41_v6 = vld [vmem:[%s8163_s0] sm:$0xff]  ;;  %v43_v8 = vld [vmem:[%s8163_s0 + $0x10] sm:$0xff] }
  0x22   :  { %v49_v7 = vld [vmem:[%s8163_s0 + $0x40] sm:$0xff]  ;;  %v51_v9 = vld [vmem:[%s8163_s0 + $0x50] sm:$0xff] }
  0x23   :  { %1664 = vmatpush2.bf16.msra.mxu0 %v5275_v34  ;;  %v5321_v10 = vld [vmem:[%s8162_s2 + $0x4e4] ss:$16 sps:$4 sm:$0xff]   ;;  %v6377_v12 = vpack.c.bf16 %v49_v7, %v41_v6  ;;  %v6379_v13 = vpack.c.bf16 %v51_v9, %v43_v8  ;;  %v5319_v14 = vld [vmem:[%s8162_s2 + $0x4e0] ss:$16 sps:$4 sm:$0xff]   ;;  %v66_v34 = vld [vmem:[%s8164_s1 + $0x8] sm:$0xff] }
  0x24   :  { %1717 = vmatpush2.bf16.msra.mxu1 %v5276_v35  ;;  %1665 = vmatprep.subr.bf16.mxu0 %v5277_v36  ;;  %v5324_v11 = vld [vmem:[%s8162_s2 + $0x6e4] ss:$16 sps:$4 sm:$0xff]   ;;  %v5322_v15 = vld [vmem:[%s8162_s2 + $0x6e0] ss:$16 sps:$4 sm:$0xff]   ;;  %v74_v35 = vld [vmem:[%s8164_s1 + $0x48] sm:$0xff] }
  0x25   :  { %1718 = vmatprep.subr.bf16.mxu1 %v5279_v37  ;;  %v5327_v16 = vld [vmem:[%s8162_s2 + $0x4c4] ss:$16 sps:$4 sm:$0xff]   ;;  %v5325_v18 = vld [vmem:[%s8162_s2 + $0x4c0] ss:$16 sps:$4 sm:$0xff]   ;;  %v6452_v37 = vpack.c.bf16 %v74_v35, %v66_v34 }
  0x26   :  { %v5330_v17 = vld [vmem:[%s8162_s2 + $0x6c4] ss:$16 sps:$4 sm:$0xff]   ;;  %v5328_v19 = vld [vmem:[%s8162_s2 + $0x6c0] ss:$16 sps:$4 sm:$0xff]  }
  0x27   :  { %1666 = vmatpush2.bf16.msra.mxu0 %v5281_v38  ;;  %v5333_v20 = vld [vmem:[%s8162_s2 + $0x4a4] ss:$16 sps:$4 sm:$0xff]   ;;  %v5331_v22 = vld [vmem:[%s8162_s2 + $0x4a0] ss:$16 sps:$4 sm:$0xff]  }
  0x28   :  { %1719 = vmatpush2.bf16.msra.mxu1 %v5282_v39  ;;  %1667 = vmatprep.subr.bf16.mxu0 %v5283_v40  ;;  %v5336_v21 = vld [vmem:[%s8162_s2 + $0x6a4] ss:$16 sps:$4 sm:$0xff]   ;;  %v5334_v23 = vld [vmem:[%s8162_s2 + $0x6a0] ss:$16 sps:$4 sm:$0xff]   ;;  %v68_v39 = vld [vmem:[%s8164_s1 + $0x18] sm:$0xff] }
  0x29   :  { %1720 = vmatprep.subr.bf16.mxu1 %v5285_v41  ;;  %v5339_v24 = vld [vmem:[%s8162_s2 + $0x484] ss:$16 sps:$4 sm:$0xff]   ;;  %v5337_v26 = vld [vmem:[%s8162_s2 + $0x480] ss:$16 sps:$4 sm:$0xff]   ;;  %v76_v40 = vld [vmem:[%s8164_s1 + $0x58] sm:$0xff] }
  0x2a   :  { %v5342_v25 = vld [vmem:[%s8162_s2 + $0x684] ss:$16 sps:$4 sm:$0xff]   ;;  %v5340_v27 = vld [vmem:[%s8162_s2 + $0x680] ss:$16 sps:$4 sm:$0xff]  }
  0x2b   :  { %1668 = vmatpush2.bf16.msra.mxu0 %v5287_v42  ;;  %v5345_v28 = vld [vmem:[%s8162_s2 + $0x464] ss:$16 sps:$4 sm:$0xff]   ;;  %v5343_v30 = vld [vmem:[%s8162_s2 + $0x460] ss:$16 sps:$4 sm:$0xff]  }
  0x2c   :  { %1721 = vmatpush2.bf16.msra.mxu1 %v5288_v43  ;;  %1669 = vmatprep.subr.bf16.mxu0 %v5289_v44  ;;  %v5348_v29 = vld [vmem:[%s8162_s2 + $0x664] ss:$16 sps:$4 sm:$0xff]   ;;  %v5346_v31 = vld [vmem:[%s8162_s2 + $0x660] ss:$16 sps:$4 sm:$0xff]   ;;  %v6468_v43 = vpack.c.bf16 %v76_v40, %v68_v39  ;;  %v5417_v39 = vld [vmem:[%s8162_s2 + $0xec] ss:$16 sps:$4 sm:$0xff]  }
  0x2d   :  { %1722 = vmatprep.subr.bf16.mxu1 %v5291_v45  ;;  %v5351_v32 = vld [vmem:[%s8162_s2 + $0x444] ss:$16 sps:$4 sm:$0xff]   ;;  %v5349_v41 = vld [vmem:[%s8162_s2 + $0x440] ss:$16 sps:$4 sm:$0xff]   ;;  %v5420_v40 = vld [vmem:[%s8162_s2 + $0x2ec] ss:$16 sps:$4 sm:$0xff]  }
  0x2e   :  { %v5354_v33 = vld [vmem:[%s8162_s2 + $0x644] ss:$16 sps:$4 sm:$0xff]   ;;  %v5352_v44 = vld [vmem:[%s8162_s2 + $0x640] ss:$16 sps:$4 sm:$0xff]  }
  0x2f   :  { %1670 = vmatpush2.bf16.msra.mxu0 %v5293_v50  ;;  %v65_v36 = vld [vmem:[%s8164_s1] sm:$0xff]  ;;  %v67_v47 = vld [vmem:[%s8164_s1 + $0x10] sm:$0xff] }
  0x30   :  { %1723 = vmatpush2.bf16.msra.mxu1 %v5294_v51  ;;  %1671 = vmatprep.subr.bf16.mxu0 %v5295_v52  ;;  %v73_v38 = vld [vmem:[%s8164_s1 + $0x40] sm:$0xff]  ;;  %v75_v48 = vld [vmem:[%s8164_s1 + $0x50] sm:$0xff] }
  0x31   :  { %1724 = vmatprep.subr.bf16.mxu1 %v5297_v55  ;;  %v6466_v42 = vpack.c.bf16 %v73_v38, %v65_v36  ;;  %v5357_v45 = vld [vmem:[%s8162_s2 + $0x424] ss:$16 sps:$4 sm:$0xff]   ;;  %v6488_v49 = vpack.c.bf16 %v75_v48, %v67_v47  ;;  %v5355_v50 = vld [vmem:[%s8162_s2 + $0x420] ss:$16 sps:$4 sm:$0xff]  }
  0x32   :  { %v5360_v46 = vld [vmem:[%s8162_s2 + $0x624] ss:$16 sps:$4 sm:$0xff]   ;;  %v5358_v51 = vld [vmem:[%s8162_s2 + $0x620] ss:$16 sps:$4 sm:$0xff]  }
  0x33   :  { %1672 = vmatpush2.bf16.msra.mxu0 %v5299_v56  ;;  %v5363_v52 = vld [vmem:[%s8162_s2 + $0x404] ss:$16 sps:$4 sm:$0xff]   ;;  %v46_v56 = vld [vmem:[%s8163_s0 + $0x28] sm:$0xff]  ;;  %v5373_v6 = vld [vmem:[%s8162_s2 + $0x5c0] ss:$16 sps:$4 sm:$0xff]  }
  0x34   :  { %1725 = vmatpush2.bf16.msra.mxu1 %v5300_v57  ;;  %1673 = vmatprep.subr.bf16.mxu0 %v5301_v58  ;;  %v5366_v55 = vld [vmem:[%s8162_s2 + $0x604] ss:$16 sps:$4 sm:$0xff]   ;;  %v54_v57 = vld [vmem:[%s8163_s0 + $0x68] sm:$0xff]  ;;  %v48_v58 = vld [vmem:[%s8163_s0 + $0x38] sm:$0xff] }
  0x35   :  { %1726 = vmatprep.subr.bf16.mxu1 %v5303_v59  ;;  %v56_v59 = vld [vmem:[%s8163_s0 + $0x78] sm:$0xff]  ;;  %v5376_v7 = vld [vmem:[%s8162_s2 + $0x7c0] ss:$16 sps:$4 sm:$0xff]   ;;  %v5381_v8 = vld [vmem:[%s8162_s2 + $0x5a4] ss:$16 sps:$4 sm:$0xff]  }
  0x36   :  { %v5384_v9 = vld [vmem:[%s8162_s2 + $0x7a4] ss:$16 sps:$4 sm:$0xff]  }
  0x37   :  { %1674 = vmatpush2.bf16.msra.mxu0 %v5305_v60  ;;  %v5361_v60 = vld [vmem:[%s8162_s2 + $0x400] ss:$16 sps:$4 sm:$0xff]  }
  0x38   :  { %1727 = vmatpush2.bf16.msra.mxu1 %v5306_v61  ;;  %1675 = vmatprep.subr.bf16.mxu0 %v5307_v62  ;;  %v5364_v61 = vld [vmem:[%s8162_s2 + $0x600] ss:$16 sps:$4 sm:$0xff]   ;;  %v5369_v62 = vld [vmem:[%s8162_s2 + $0x5e4] ss:$16 sps:$4 sm:$0xff]  }
  0x39   :  { %1728 = vmatprep.subr.bf16.mxu1 %v5309_v63  ;;  %v6524_v63 = vpack.c.bf16 %v54_v57, %v46_v56  ;;  %v45_v34 = vld [vmem:[%s8163_s0 + $0x20] sm:$0xff]  ;;  %v47_v36 = vld [vmem:[%s8163_s0 + $0x30] sm:$0xff]  ;;  %v5421_v56 = vld [vmem:[%s8162_s2 + $0xc8] ss:$16 sps:$4 sm:$0xff]  }
  0x3a   :  { %v53_v35 = vld [vmem:[%s8163_s0 + $0x60] sm:$0xff]  ;;  %v55_v38 = vld [vmem:[%s8163_s0 + $0x70] sm:$0xff]  ;;  %v5424_v57 = vld [vmem:[%s8162_s2 + $0x2c8] ss:$16 sps:$4 sm:$0xff]  }
  0x3b   :  { %1676 = vmatpush2.bf16.msra.mxu0 %v5311_v0  ;;  %v6526_v0 = vpack.c.bf16 %v56_v59, %v48_v58  ;;  %v6653_v47 = vpack.c.bf16 %v53_v35, %v45_v34  ;;  %v6655_v48 = vpack.c.bf16 %v55_v38, %v47_v36  ;;  %v69_v59 = vld [vmem:[%s8164_s1 + $0x20] sm:$0xff]  ;;  %v5469_v34 = vld [vmem:[%s8162_s2 + $0x1c8] ss:$16 sps:$4 sm:$0xff]   ;;  %v5477_v36 = vld [vmem:[%s8162_s2 + $0x1ac] ss:$16 sps:$4 sm:$0xff]  }
  0x3c   :  { %1729 = vmatpush2.bf16.msra.mxu1 %v5312_v1  ;;  %1677 = vmatprep.subr.bf16.mxu0 %v5313_v2  ;;  %v5372_v1 = vld [vmem:[%s8162_s2 + $0x7e4] ss:$16 sps:$4 sm:$0xff]   ;;  %v5367_v2 = vld [vmem:[%s8162_s2 + $0x5e0] ss:$16 sps:$4 sm:$0xff]   ;;  %v5472_v35 = vld [vmem:[%s8162_s2 + $0x3c8] ss:$16 sps:$4 sm:$0xff]  }
  0x3d   :  { %1730 = vmatprep.subr.bf16.mxu1 %v5315_v3  ;;  %v5370_v3 = vld [vmem:[%s8162_s2 + $0x7e0] ss:$16 sps:$4 sm:$0xff]   ;;  %v5480_v38 = vld [vmem:[%s8162_s2 + $0x3ac] ss:$16 sps:$4 sm:$0xff]  }
  0x3f   :  { %1678 = vmatpush2.bf16.msra.mxu0 %v5317_v4  ;;  %v5375_v4 = vld [vmem:[%s8162_s2 + $0x5c4] ss:$16 sps:$4 sm:$0xff]  }
  0x40   :  { %1731 = vmatpush2.bf16.msra.mxu1 %v5318_v5  ;;  %1753 = vmatprep.subr.bf16.mxu0 %v5321_v10  ;;  %v5378_v5 = vld [vmem:[%s8162_s2 + $0x7c4] ss:$16 sps:$4 sm:$0xff]   ;;  %v5379_v10 = vld [vmem:[%s8162_s2 + $0x5a0] ss:$16 sps:$4 sm:$0xff]  }
  0x41   :  { %1806 = vmatprep.subr.bf16.mxu1 %v5324_v11  ;;  %v5382_v11 = vld [vmem:[%s8162_s2 + $0x7a0] ss:$16 sps:$4 sm:$0xff]  }
  0x42   :  { %1680 = vmatmul.mubr.bf16.vlgmr.msra.gmra.mxu0 %v6377_v12 }
  0x43   :  { %1733 = vmatmul.mubr.bf16.vlgmr.msra.gmra.mxu1 %v6379_v13  ;;  %1754 = vmatpush1.bf16.msra.mxu0 %v5319_v14  ;;  %v5387_v14 = vld [vmem:[%s8162_s2 + $0x584] ss:$16 sps:$4 sm:$0xff]  }
  0x44   :  { %1807 = vmatpush1.bf16.msra.mxu1 %v5322_v15  ;;  %1755 = vmatprep.subr.bf16.mxu0 %v5327_v16  ;;  %v5390_v15 = vld [vmem:[%s8162_s2 + $0x784] ss:$16 sps:$4 sm:$0xff]   ;;  %v5385_v16 = vld [vmem:[%s8162_s2 + $0x580] ss:$16 sps:$4 sm:$0xff]  }
  0x45   :  { %1808 = vmatprep.subr.bf16.mxu1 %v5330_v17  ;;  %1689 = vmatprep.mubr.bf16.mxu0 %v6452_v37  ;;  %v5388_v17 = vld [vmem:[%s8162_s2 + $0x780] ss:$16 sps:$4 sm:$0xff]  }
  0x46   :  { %1742 = vmatprep.mubr.bf16.mxu1 %v6468_v43 }
  0x47   :  { %1756 = vmatpush1.bf16.msra.mxu0 %v5325_v18  ;;  %v5393_v18 = vld [vmem:[%s8162_s2 + $0x564] ss:$16 sps:$4 sm:$0xff]  }
  0x48   :  { %1809 = vmatpush1.bf16.msra.mxu1 %v5328_v19  ;;  %1757 = vmatprep.subr.bf16.mxu0 %v5333_v20  ;;  %v5396_v19 = vld [vmem:[%s8162_s2 + $0x764] ss:$16 sps:$4 sm:$0xff]   ;;  %v5391_v20 = vld [vmem:[%s8162_s2 + $0x560] ss:$16 sps:$4 sm:$0xff]  }
  0x49   :  { %1810 = vmatprep.subr.bf16.mxu1 %v5336_v21  ;;  %v5394_v21 = vld [vmem:[%s8162_s2 + $0x760] ss:$16 sps:$4 sm:$0xff]  }
  0x4a   :  { %1690 = vmatmul.mubr.bf16.gmra.mxu0 %v6466_v42 }
  0x4b   :  { %1758 = vmatpush1.bf16.msra.mxu0 %v5331_v22  ;;  %1743 = vmatmul.mubr.bf16.gmra.mxu1 %v6488_v49  ;;  %v5399_v22 = vld [vmem:[%s8162_s2 + $0x544] ss:$16 sps:$4 sm:$0xff]  }
  0x4c   :  { %1811 = vmatpush1.bf16.msra.mxu1 %v5334_v23  ;;  %1759 = vmatprep.subr.bf16.mxu0 %v5339_v24  ;;  %v5402_v23 = vld [vmem:[%s8162_s2 + $0x744] ss:$16 sps:$4 sm:$0xff]   ;;  %v5397_v24 = vld [vmem:[%s8162_s2 + $0x540] ss:$16 sps:$4 sm:$0xff]  }
  0x4d   :  { %1812 = vmatprep.subr.bf16.mxu1 %v5342_v25  ;;  %1785 = vmatprep.mubr.bf16.mxu0 %v6524_v63  ;;  %v5400_v25 = vld [vmem:[%s8162_s2 + $0x740] ss:$16 sps:$4 sm:$0xff]  }
  0x4e   :  { %1838 = vmatprep.mubr.bf16.mxu1 %v6526_v0 }
  0x4f   :  { %1760 = vmatpush1.bf16.msra.mxu0 %v5337_v26  ;;  %v5405_v26 = vld [vmem:[%s8162_s2 + $0x524] ss:$16 sps:$4 sm:$0xff]  }
  0x50   :  { %1813 = vmatpush1.bf16.msra.mxu1 %v5340_v27  ;;  %1761 = vmatprep.subr.bf16.mxu0 %v5345_v28  ;;  %v5408_v27 = vld [vmem:[%s8162_s2 + $0x724] ss:$16 sps:$4 sm:$0xff]   ;;  %v5403_v28 = vld [vmem:[%s8162_s2 + $0x520] ss:$16 sps:$4 sm:$0xff]  }
  0x51   :  { %1814 = vmatprep.subr.bf16.mxu1 %v5348_v29  ;;  %v5406_v29 = vld [vmem:[%s8162_s2 + $0x720] ss:$16 sps:$4 sm:$0xff]  }
  0x53   :  { %1762 = vmatpush1.bf16.msra.mxu0 %v5343_v30  ;;  %v5411_v30 = vld [vmem:[%s8162_s2 + $0x504] ss:$16 sps:$4 sm:$0xff]  }
  0x54   :  { %1815 = vmatpush1.bf16.msra.mxu1 %v5346_v31  ;;  %1763 = vmatprep.subr.bf16.mxu0 %v5351_v32  ;;  %v5414_v31 = vld [vmem:[%s8162_s2 + $0x704] ss:$16 sps:$4 sm:$0xff]   ;;  %v5409_v32 = vld [vmem:[%s8162_s2 + $0x500] ss:$16 sps:$4 sm:$0xff]  }
  0x55   :  { %1816 = vmatprep.subr.bf16.mxu1 %v5354_v33  ;;  %v5412_v33 = vld [vmem:[%s8162_s2 + $0x700] ss:$16 sps:$4 sm:$0xff]  }
  0x57   :  { %1764 = vmatpush1.bf16.msra.mxu0 %v5349_v41  ;;  %v5415_v41 = vld [vmem:[%s8162_s2 + $0xe8] ss:$16 sps:$4 sm:$0xff]  }
  0x58   :  { %1817 = vmatpush1.bf16.msra.mxu1 %v5352_v44  ;;  %1765 = vmatprep.subr.bf16.mxu0 %v5357_v45  ;;  %v5418_v44 = vld [vmem:[%s8162_s2 + $0x2e8] ss:$16 sps:$4 sm:$0xff]  }
  0x59   :  { %1818 = vmatprep.subr.bf16.mxu1 %v5360_v46  ;;  %v70_v45 = vld [vmem:[%s8164_s1 + $0x28] sm:$0xff] }
  0x5a   :  { %v78_v46 = vld [vmem:[%s8164_s1 + $0x68] sm:$0xff] }
  0x5b   :  { %1766 = vmatpush1.bf16.msra.mxu0 %v5355_v50  ;;  %v72_v50 = vld [vmem:[%s8164_s1 + $0x38] sm:$0xff]  ;;  %v6675_v58 = vpack.c.bf16 %v78_v46, %v70_v45 }
  0x5c   :  { %1819 = vmatpush1.bf16.msra.mxu1 %v5358_v51  ;;  %1767 = vmatprep.subr.bf16.mxu0 %v5363_v52  ;;  %v80_v51 = vld [vmem:[%s8164_s1 + $0x78] sm:$0xff] }
  0x5d   :  { %1820 = vmatprep.subr.bf16.mxu1 %v5366_v55  ;;  %v5423_v52 = vld [vmem:[%s8162_s2 + $0xcc] ss:$16 sps:$4 sm:$0xff]   ;;  %v5481_v45 = vld [vmem:[%s8162_s2 + $0x188] ss:$16 sps:$4 sm:$0xff]  }
  0x5e   :  { %v5426_v55 = vld [vmem:[%s8162_s2 + $0x2cc] ss:$16 sps:$4 sm:$0xff]   ;;  %v5484_v46 = vld [vmem:[%s8162_s2 + $0x388] ss:$16 sps:$4 sm:$0xff]  }
  0x5f   :  { %1768 = vmatpush1.bf16.msra.mxu0 %v5361_v60  ;;  %v77_v60 = vld [vmem:[%s8164_s1 + $0x60] sm:$0xff] }
  0x60   :  { %1821 = vmatpush1.bf16.msra.mxu1 %v5364_v61  ;;  %1769 = vmatprep.subr.bf16.mxu0 %v5369_v62  ;;  %v6683_v61 = vpack.c.bf16 %v80_v51, %v72_v50  ;;  %v5429_v62 = vld [vmem:[%s8162_s2 + $0xac] ss:$16 sps:$4 sm:$0xff]  }
  0x61   :  { %1822 = vmatprep.subr.bf16.mxu1 %v5372_v1  ;;  %v71_v1 = vld [vmem:[%s8164_s1 + $0x30] sm:$0xff]  ;;  %v5489_v50 = vld [vmem:[%s8162_s2 + $0x16c] ss:$16 sps:$4 sm:$0xff]  }
  0x62   :  { %v5492_v51 = vld [vmem:[%s8162_s2 + $0x36c] ss:$16 sps:$4 sm:$0xff]  }
  0x63   :  { %1770 = vmatpush2.bf16.msra.mxu0 %v5367_v2  ;;  %v79_v2 = vld [vmem:[%s8164_s1 + $0x70] sm:$0xff] }
  0x64   :  { %1823 = vmatpush2.bf16.msra.mxu1 %v5370_v3  ;;  %1771 = vmatprep.subr.bf16.mxu0 %v5375_v4  ;;  %v5432_v3 = vld [vmem:[%s8162_s2 + $0x2ac] ss:$16 sps:$4 sm:$0xff]   ;;  %v6701_v4 = vpack.c.bf16 %v77_v60, %v69_v59  ;;  %v5493_v59 = vld [vmem:[%s8162_s2 + $0x148] ss:$16 sps:$4 sm:$0xff]  }
  0x65   :  { %1824 = vmatprep.subr.bf16.mxu1 %v5378_v5  ;;  %v5427_v5 = vld [vmem:[%s8162_s2 + $0xa8] ss:$16 sps:$4 sm:$0xff]  }
  0x66   :  { %v5496_v60 = vld [vmem:[%s8162_s2 + $0x348] ss:$16 sps:$4 sm:$0xff]  }
  0x67   :  { %1772 = vmatpush2.bf16.msra.mxu0 %v5373_v6  ;;  %v5430_v6 = vld [vmem:[%s8162_s2 + $0x2a8] ss:$16 sps:$4 sm:$0xff]  }
  0x68   :  { %1825 = vmatpush2.bf16.msra.mxu1 %v5376_v7  ;;  %1773 = vmatprep.subr.bf16.mxu0 %v5381_v8  ;;  %v6709_v7 = vpack.c.bf16 %v79_v2, %v71_v1  ;;  %v5435_v8 = vld [vmem:[%s8162_s2 + $0x8c] ss:$16 sps:$4 sm:$0xff]   ;;  %v5499_v2 = vld [vmem:[%s8162_s2 + $0x128] ss:$16 sps:$4 sm:$0xff]  }
  0x69   :  { %1826 = vmatprep.subr.bf16.mxu1 %v5384_v9  ;;  %v5438_v9 = vld [vmem:[%s8162_s2 + $0x28c] ss:$16 sps:$4 sm:$0xff]  }
  0x6a   :  { %v5504_v1 = vld [vmem:[%s8162_s2 + $0x32c] ss:$16 sps:$4 sm:$0xff]  }
  0x6b   :  { %1774 = vmatpush2.bf16.msra.mxu0 %v5379_v10  ;;  %v5433_v10 = vld [vmem:[%s8162_s2 + $0x88] ss:$16 sps:$4 sm:$0xff]  }
  0x6c   :  { %1827 = vmatpush2.bf16.msra.mxu1 %v5382_v11  ;;  %1775 = vmatprep.subr.bf16.mxu0 %v5387_v14  ;;  %v5436_v11 = vld [vmem:[%s8162_s2 + $0x288] ss:$16 sps:$4 sm:$0xff]   ;;  %v5441_v14 = vld [vmem:[%s8162_s2 + $0x6c] ss:$16 sps:$4 sm:$0xff]  }
  0x6d   :  { %1828 = vmatprep.subr.bf16.mxu1 %v5390_v15  ;;  %v5444_v15 = vld [vmem:[%s8162_s2 + $0x26c] ss:$16 sps:$4 sm:$0xff]  }
  0x6f   :  { %1776 = vmatpush2.bf16.msra.mxu0 %v5385_v16  ;;  %v5439_v16 = vld [vmem:[%s8162_s2 + $0x68] ss:$16 sps:$4 sm:$0xff]  }
  0x70   :  { %1829 = vmatpush2.bf16.msra.mxu1 %v5388_v17  ;;  %1777 = vmatprep.subr.bf16.mxu0 %v5393_v18  ;;  %v5442_v17 = vld [vmem:[%s8162_s2 + $0x268] ss:$16 sps:$4 sm:$0xff]   ;;  %v5447_v18 = vld [vmem:[%s8162_s2 + $0x4c] ss:$16 sps:$4 sm:$0xff]  }
  0x71   :  { %1830 = vmatprep.subr.bf16.mxu1 %v5396_v19  ;;  %v5448_v19 = vld [vmem:[%s8162_s2 + $0x248] ss:$16 sps:$4 sm:$0xff]  }
  0x73   :  { %1778 = vmatpush2.bf16.msra.mxu0 %v5391_v20  ;;  %v5453_v20 = vld [vmem:[%s8162_s2 + $0x2c] ss:$16 sps:$4 sm:$0xff]  }
  0x74   :  { %1831 = vmatpush2.bf16.msra.mxu1 %v5394_v21  ;;  %1779 = vmatprep.subr.bf16.mxu0 %v5399_v22  ;;  %v5456_v21 = vld [vmem:[%s8162_s2 + $0x22c] ss:$16 sps:$4 sm:$0xff]   ;;  %v5451_v22 = vld [vmem:[%s8162_s2 + $0x28] ss:$16 sps:$4 sm:$0xff]  }
  0x75   :  { %1832 = vmatprep.subr.bf16.mxu1 %v5402_v23  ;;  %v5454_v23 = vld [vmem:[%s8162_s2 + $0x228] ss:$16 sps:$4 sm:$0xff]  }
  0x77   :  { %1780 = vmatpush2.bf16.msra.mxu0 %v5397_v24  ;;  %v5459_v24 = vld [vmem:[%s8162_s2 + $0xc] ss:$16 sps:$4 sm:$0xff]  }
  0x78   :  { %1833 = vmatpush2.bf16.msra.mxu1 %v5400_v25  ;;  %1781 = vmatprep.subr.bf16.mxu0 %v5405_v26  ;;  %v5462_v25 = vld [vmem:[%s8162_s2 + $0x20c] ss:$16 sps:$4 sm:$0xff]   ;;  %v5457_v26 = vld [vmem:[%s8162_s2 + $0x8] ss:$16 sps:$4 sm:$0xff]  }
  0x79   :  { %1834 = vmatprep.subr.bf16.mxu1 %v5408_v27  ;;  %v5460_v27 = vld [vmem:[%s8162_s2 + $0x208] ss:$16 sps:$4 sm:$0xff]  }
  0x7b   :  { %1782 = vmatpush2.bf16.msra.mxu0 %v5403_v28  ;;  %v5465_v28 = vld [vmem:[%s8162_s2 + $0x1ec] ss:$16 sps:$4 sm:$0xff]  }
  0x7c   :  { %1835 = vmatpush2.bf16.msra.mxu1 %v5406_v29  ;;  %1783 = vmatprep.subr.bf16.mxu0 %v5411_v30  ;;  %v5468_v29 = vld [vmem:[%s8162_s2 + $0x3ec] ss:$16 sps:$4 sm:$0xff]   ;;  %v5463_v30 = vld [vmem:[%s8162_s2 + $0x1e8] ss:$16 sps:$4 sm:$0xff]  }
  0x7d   :  { %1836 = vmatprep.subr.bf16.mxu1 %v5414_v31  ;;  %v5466_v31 = vld [vmem:[%s8162_s2 + $0x3e8] ss:$16 sps:$4 sm:$0xff]  }
  0x7f   :  { %1784 = vmatpush2.bf16.msra.mxu0 %v5409_v32  ;;  %v5471_v32 = vld [vmem:[%s8162_s2 + $0x1cc] ss:$16 sps:$4 sm:$0xff]  }
  0x80   :  { %1837 = vmatpush2.bf16.msra.mxu1 %v5412_v33  ;;  %1859 = vmatprep.subr.bf16.mxu0 %v5417_v39  ;;  %v5474_v33 = vld [vmem:[%s8162_s2 + $0x3cc] ss:$16 sps:$4 sm:$0xff]   ;;  %v5475_v39 = vld [vmem:[%s8162_s2 + $0x1a8] ss:$16 sps:$4 sm:$0xff]  }
  0x81   :  { %1912 = vmatprep.subr.bf16.mxu1 %v5420_v40  ;;  %v5478_v40 = vld [vmem:[%s8162_s2 + $0x3a8] ss:$16 sps:$4 sm:$0xff]  }
  0x82   :  { %1786 = vmatmul.mubr.bf16.vlgmr.msra.gmra.mxu0 %v6653_v47 }
  0x83   :  { %1839 = vmatmul.mubr.bf16.vlgmr.msra.gmra.mxu1 %v6655_v48  ;;  %1860 = vmatpush1.bf16.msra.mxu0 %v5415_v41  ;;  %v5483_v41 = vld [vmem:[%s8162_s2 + $0x18c] ss:$16 sps:$4 sm:$0xff]  }
  0x84   :  { %1913 = vmatpush1.bf16.msra.mxu1 %v5418_v44  ;;  %1861 = vmatprep.subr.bf16.mxu0 %v5423_v52  ;;  %v5486_v44 = vld [vmem:[%s8162_s2 + $0x38c] ss:$16 sps:$4 sm:$0xff]   ;;  %v5487_v52 = vld [vmem:[%s8162_s2 + $0x168] ss:$16 sps:$4 sm:$0xff]  }
  0x85   :  { %1914 = vmatprep.subr.bf16.mxu1 %v5426_v55  ;;  %1795 = vmatprep.mubr.bf16.mxu0 %v6675_v58  ;;  %v5490_v55 = vld [vmem:[%s8162_s2 + $0x368] ss:$16 sps:$4 sm:$0xff]  }
  0x86   :  { %1848 = vmatprep.mubr.bf16.mxu1 %v6683_v61 }
  0x87   :  { %1862 = vmatpush1.bf16.msra.mxu0 %v5421_v56  ;;  %v5495_v56 = vld [vmem:[%s8162_s2 + $0x14c] ss:$16 sps:$4 sm:$0xff]  }
  0x88   :  { %1915 = vmatpush1.bf16.msra.mxu1 %v5424_v57  ;;  %1863 = vmatprep.subr.bf16.mxu0 %v5429_v62  ;;  %v5498_v57 = vld [vmem:[%s8162_s2 + $0x34c] ss:$16 sps:$4 sm:$0xff]  }
  0x89   :  { %1916 = vmatprep.subr.bf16.mxu1 %v5432_v3  ;;  %v5501_v62 = vld [vmem:[%s8162_s2 + $0x12c] ss:$16 sps:$4 sm:$0xff]   ;;  %v5502_v3 = vld [vmem:[%s8162_s2 + $0x328] ss:$16 sps:$4 sm:$0xff]  }
  0x8a   :  { %1796 = vmatmul.mubr.bf16.gmra.mxu0 %v6701_v4 }
  0x8b   :  { %1849 = vmatmul.mubr.bf16.gmra.mxu1 %v6709_v7  ;;  %1864 = vmatpush1.bf16.msra.mxu0 %v5427_v5  ;;  %v5507_v5 = vld [vmem:[%s8162_s2 + $0x10c] ss:$16 sps:$4 sm:$0xff]  }
  0x8c   :  { %1917 = vmatpush1.bf16.msra.mxu1 %v5430_v6  ;;  %1865 = vmatprep.subr.bf16.mxu0 %v5435_v8  ;;  %v5510_v6 = vld [vmem:[%s8162_s2 + $0x30c] ss:$16 sps:$4 sm:$0xff]   ;;  %v5505_v8 = vld [vmem:[%s8162_s2 + $0x108] ss:$16 sps:$4 sm:$0xff]  }
  0x8d   :  { %1918 = vmatprep.subr.bf16.mxu1 %v5438_v9  ;;  %1891 = vmatprep.mubr.bf16.mxu0 %v6308_v53  ;;  %v5450_v53 = vld [vmem:[%s8162_s2 + $0x24c] ss:$16 sps:$4 sm:$0xff]   ;;  %v5508_v9 = vld [vmem:[%s8162_s2 + $0x308] ss:$16 sps:$4 sm:$0xff]  }
  0x8e   :  { %1944 = vmatprep.mubr.bf16.mxu1 %v6310_v54  ;;  %v5445_v54 = vld [vmem:[%s8162_s2 + $0x48] ss:$16 sps:$4 sm:$0xff]  }
  0x8f   :  { %1866 = vmatpush1.bf16.msra.mxu0 %v5433_v10  ;;  %v5513_v10 = vld [vmem:[%s8162_s2 + $0x4ec] ss:$16 sps:$4 sm:$0xff]  }
  0x90   :  { %1919 = vmatpush1.bf16.msra.mxu1 %v5436_v11  ;;  %1867 = vmatprep.subr.bf16.mxu0 %v5441_v14  ;;  %v5516_v11 = vld [vmem:[%s8162_s2 + $0x6ec] ss:$16 sps:$4 sm:$0xff]   ;;  %v5511_v14 = vld [vmem:[%s8162_s2 + $0x4e8] ss:$16 sps:$4 sm:$0xff]  }
  0x91   :  { %1920 = vmatprep.subr.bf16.mxu1 %v5444_v15  ;;  %v5514_v15 = vld [vmem:[%s8162_s2 + $0x6e8] ss:$16 sps:$4 sm:$0xff]  }
  0x93   :  { %1868 = vmatpush1.bf16.msra.mxu0 %v5439_v16  ;;  %v5519_v16 = vld [vmem:[%s8162_s2 + $0x4cc] ss:$16 sps:$4 sm:$0xff]  }
  0x94   :  { %1921 = vmatpush1.bf16.msra.mxu1 %v5442_v17  ;;  %1869 = vmatprep.subr.bf16.mxu0 %v5447_v18  ;;  %v5522_v17 = vld [vmem:[%s8162_s2 + $0x6cc] ss:$16 sps:$4 sm:$0xff]   ;;  %v5517_v18 = vld [vmem:[%s8162_s2 + $0x4c8] ss:$16 sps:$4 sm:$0xff]  }
  0x95   :  { %1922 = vmatprep.subr.bf16.mxu1 %v5450_v53  ;;  %v5520_v53 = vld [vmem:[%s8162_s2 + $0x6c8] ss:$16 sps:$4 sm:$0xff]  }
  0x97   :  { %1870 = vmatpush1.bf16.msra.mxu0 %v5445_v54  ;;  %v5525_v54 = vld [vmem:[%s8162_s2 + $0x4ac] ss:$16 sps:$4 sm:$0xff]  }
  0x98   :  { %1923 = vmatpush1.bf16.msra.mxu1 %v5448_v19  ;;  %1871 = vmatprep.subr.bf16.mxu0 %v5453_v20  ;;  %v5528_v19 = vld [vmem:[%s8162_s2 + $0x6ac] ss:$16 sps:$4 sm:$0xff]  }
  0x99   :  { %1924 = vmatprep.subr.bf16.mxu1 %v5456_v21  ;;  %v5531_v20 = vld [vmem:[%s8162_s2 + $0x48c] ss:$16 sps:$4 sm:$0xff]  }
  0x9a   :  { %v5534_v21 = vld [vmem:[%s8162_s2 + $0x68c] ss:$16 sps:$4 sm:$0xff]  }
  0x9b   :  { %1872 = vmatpush1.bf16.msra.mxu0 %v5451_v22  ;;  %v5529_v22 = vld [vmem:[%s8162_s2 + $0x488] ss:$16 sps:$4 sm:$0xff]  }
  0x9c   :  { %1925 = vmatpush1.bf16.msra.mxu1 %v5454_v23  ;;  %1873 = vmatprep.subr.bf16.mxu0 %v5459_v24  ;;  %v5540_v23 = vld [vmem:[%s8162_s2 + $0x66c] ss:$16 sps:$4 sm:$0xff]   ;;  %v5535_v24 = vld [vmem:[%s8162_s2 + $0x468] ss:$16 sps:$4 sm:$0xff]  }
  0x9d   :  { %1926 = vmatprep.subr.bf16.mxu1 %v5462_v25  ;;  %v5538_v25 = vld [vmem:[%s8162_s2 + $0x668] ss:$16 sps:$4 sm:$0xff]  }
  0x9f   :  { %1874 = vmatpush1.bf16.msra.mxu0 %v5457_v26  ;;  %v5541_v26 = vld [vmem:[%s8162_s2 + $0x448] ss:$16 sps:$4 sm:$0xff]  }
  0xa0   :  { %1927 = vmatpush1.bf16.msra.mxu1 %v5460_v27  ;;  %1875 = vmatprep.subr.bf16.mxu0 %v5465_v28  ;;  %v5552_v27 = vld [vmem:[%s8162_s2 + $0x62c] ss:$16 sps:$4 sm:$0xff]   ;;  %v5547_v28 = vld [vmem:[%s8162_s2 + $0x428] ss:$16 sps:$4 sm:$0xff]  }
  0xa1   :  { %1928 = vmatprep.subr.bf16.mxu1 %v5468_v29  ;;  %v5550_v29 = vld [vmem:[%s8162_s2 + $0x628] ss:$16 sps:$4 sm:$0xff]  }
  0xa3   :  { %1876 = vmatpush2.bf16.msra.mxu0 %v5463_v30  ;;  %v5555_v30 = vld [vmem:[%s8162_s2 + $0x40c] ss:$16 sps:$4 sm:$0xff]  }
  0xa4   :  { %1929 = vmatpush2.bf16.msra.mxu1 %v5466_v31  ;;  %1877 = vmatprep.subr.bf16.mxu0 %v5471_v32  ;;  %v5558_v31 = vld [vmem:[%s8162_s2 + $0x60c] ss:$16 sps:$4 sm:$0xff]   ;;  %v5553_v32 = vld [vmem:[%s8162_s2 + $0x408] ss:$16 sps:$4 sm:$0xff]  }
  0xa5   :  { %1930 = vmatprep.subr.bf16.mxu1 %v5474_v33  ;;  %v5556_v33 = vld [vmem:[%s8162_s2 + $0x608] ss:$16 sps:$4 sm:$0xff]  }
  0xa7   :  { %1878 = vmatpush2.bf16.msra.mxu0 %v5469_v34  ;;  %v5561_v34 = vld [vmem:[%s8162_s2 + $0x5ec] ss:$16 sps:$4 sm:$0xff]  }
  0xa8   :  { %1931 = vmatpush2.bf16.msra.mxu1 %v5472_v35  ;;  %1879 = vmatprep.subr.bf16.mxu0 %v5477_v36  ;;  %v5564_v35 = vld [vmem:[%s8162_s2 + $0x7ec] ss:$16 sps:$4 sm:$0xff]   ;;  %v5559_v36 = vld [vmem:[%s8162_s2 + $0x5e8] ss:$16 sps:$4 sm:$0xff]  }
  0xa9   :  { %1932 = vmatprep.subr.bf16.mxu1 %v5480_v38  ;;  %v5562_v38 = vld [vmem:[%s8162_s2 + $0x7e8] ss:$16 sps:$4 sm:$0xff]  }
  0xab   :  { %1880 = vmatpush2.bf16.msra.mxu0 %v5475_v39  ;;  %v5567_v39 = vld [vmem:[%s8162_s2 + $0x5cc] ss:$16 sps:$4 sm:$0xff]  }
  0xac   :  { %1933 = vmatpush2.bf16.msra.mxu1 %v5478_v40  ;;  %1881 = vmatprep.subr.bf16.mxu0 %v5483_v41  ;;  %v5570_v40 = vld [vmem:[%s8162_s2 + $0x7cc] ss:$16 sps:$4 sm:$0xff]   ;;  %v5565_v41 = vld [vmem:[%s8162_s2 + $0x5c8] ss:$16 sps:$4 sm:$0xff]  }
  0xad   :  { %1934 = vmatprep.subr.bf16.mxu1 %v5486_v44  ;;  %v5568_v44 = vld [vmem:[%s8162_s2 + $0x7c8] ss:$16 sps:$4 sm:$0xff]  }
  0xaf   :  { %1882 = vmatpush2.bf16.msra.mxu0 %v5481_v45  ;;  %v5573_v45 = vld [vmem:[%s8162_s2 + $0x5ac] ss:$16 sps:$4 sm:$0xff]  }
  0xb0   :  { %1935 = vmatpush2.bf16.msra.mxu1 %v5484_v46  ;;  %1883 = vmatprep.subr.bf16.mxu0 %v5489_v50  ;;  %v5576_v46 = vld [vmem:[%s8162_s2 + $0x7ac] ss:$16 sps:$4 sm:$0xff]   ;;  %v5571_v50 = vld [vmem:[%s8162_s2 + $0x5a8] ss:$16 sps:$4 sm:$0xff]  }
  0xb1   :  { %1936 = vmatprep.subr.bf16.mxu1 %v5492_v51  ;;  %v5574_v51 = vld [vmem:[%s8162_s2 + $0x7a8] ss:$16 sps:$4 sm:$0xff]  }
  0xb3   :  { %1884 = vmatpush2.bf16.msra.mxu0 %v5487_v52  ;;  %v5579_v52 = vld [vmem:[%s8162_s2 + $0x58c] ss:$16 sps:$4 sm:$0xff]  }
  0xb4   :  { %1937 = vmatpush2.bf16.msra.mxu1 %v5490_v55  ;;  %1885 = vmatprep.subr.bf16.mxu0 %v5495_v56  ;;  %v5582_v55 = vld [vmem:[%s8162_s2 + $0x78c] ss:$16 sps:$4 sm:$0xff]   ;;  %v5577_v56 = vld [vmem:[%s8162_s2 + $0x588] ss:$16 sps:$4 sm:$0xff]  }
  0xb5   :  { %1938 = vmatprep.subr.bf16.mxu1 %v5498_v57  ;;  %v5580_v57 = vld [vmem:[%s8162_s2 + $0x788] ss:$16 sps:$4 sm:$0xff]  }
  0xb7   :  { %1886 = vmatpush2.bf16.msra.mxu0 %v5493_v59  ;;  %v5585_v59 = vld [vmem:[%s8162_s2 + $0x56c] ss:$16 sps:$4 sm:$0xff]  }
  0xb8   :  { %1939 = vmatpush2.bf16.msra.mxu1 %v5496_v60  ;;  %1887 = vmatprep.subr.bf16.mxu0 %v5501_v62  ;;  %v5588_v60 = vld [vmem:[%s8162_s2 + $0x76c] ss:$16 sps:$4 sm:$0xff]   ;;  %v5583_v62 = vld [vmem:[%s8162_s2 + $0x568] ss:$16 sps:$4 sm:$0xff]  }
  0xb9   :  { %1940 = vmatprep.subr.bf16.mxu1 %v5504_v1  ;;  %v5586_v1 = vld [vmem:[%s8162_s2 + $0x768] ss:$16 sps:$4 sm:$0xff]  }
  0xbb   :  { %1888 = vmatpush2.bf16.msra.mxu0 %v5499_v2  ;;  %v5591_v2 = vld [vmem:[%s8162_s2 + $0x54c] ss:$16 sps:$4 sm:$0xff]  }
  0xbc   :  { %1941 = vmatpush2.bf16.msra.mxu1 %v5502_v3  ;;  %1889 = vmatprep.subr.bf16.mxu0 %v5507_v5  ;;  %v5594_v3 = vld [vmem:[%s8162_s2 + $0x74c] ss:$16 sps:$4 sm:$0xff]   ;;  %v5589_v5 = vld [vmem:[%s8162_s2 + $0x548] ss:$16 sps:$4 sm:$0xff]  }
  0xbd   :  { %1942 = vmatprep.subr.bf16.mxu1 %v5510_v6  ;;  %v5592_v6 = vld [vmem:[%s8162_s2 + $0x748] ss:$16 sps:$4 sm:$0xff]  }
  0xbf   :  { %1890 = vmatpush2.bf16.msra.mxu0 %v5505_v8  ;;  %v347_v8 = vlaneseq }
  0xc0   :  { %1943 = vmatpush2.bf16.msra.mxu1 %v5508_v9  ;;  %1965 = vmatprep.subr.bf16.mxu0 %v5513_v10  ;;  %v5597_v9 = vld [vmem:[%s8162_s2 + $0x52c] ss:$16 sps:$4 sm:$0xff]  }
  0xc1   :  { %2018 = vmatprep.subr.bf16.mxu1 %v5516_v11  ;;  %v5600_v10 = vld [vmem:[%s8162_s2 + $0x72c] ss:$16 sps:$4 sm:$0xff]   ;;  %v5595_v11 = vld [vmem:[%s8162_s2 + $0x528] ss:$16 sps:$4 sm:$0xff]  }
  0xc2   :  { %1892 = vmatmul.mubr.bf16.vlgmr.msra.gmra.mxu0 %v6377_v12  ;;  %v5523_v12 = vld [vmem:[%s8162_s2 + $0x4a8] ss:$16 sps:$4 sm:$0xff]  }
  0xc3   :  { %1945 = vmatmul.mubr.bf16.vlgmr.msra.gmra.mxu1 %v6379_v13  ;;  %1966 = vmatpush1.bf16.msra.mxu0 %v5511_v14  ;;  %v5526_v13 = vld [vmem:[%s8162_s2 + $0x6a8] ss:$16 sps:$4 sm:$0xff]  }
  0xc4   :  { %2019 = vmatpush1.bf16.msra.mxu1 %v5514_v15  ;;  %1967 = vmatprep.subr.bf16.mxu0 %v5519_v16  ;;  %v5598_v14 = vld [vmem:[%s8162_s2 + $0x728] ss:$16 sps:$4 sm:$0xff]   ;;  %v7059_v15 = vshrl.u32 %v347_v8, 7  ;;  %v5603_v16 = vld [vmem:[%s8162_s2 + $0x50c] ss:$16 sps:$4 sm:$0xff]  }
  0xc5   :  { %2020 = vmatprep.subr.bf16.mxu1 %v5522_v17  ;;  %1901 = vmatprep.mubr.bf16.mxu0 %v6452_v37  ;;  %v5532_v37 = vld [vmem:[%s8162_s2 + $0x688] ss:$16 sps:$4 sm:$0xff]   ;;  %v5606_v17 = vld [vmem:[%s8162_s2 + $0x70c] ss:$16 sps:$4 sm:$0xff]   ;;  %v5640_v8 = vld [vmem:[%s8165_s5 + $0x180] ss:$16 sps:$4 sm:$0xff]  }
  0xc6   :  { %1954 = vmatprep.mubr.bf16.mxu1 %v6468_v43  ;;  %v5537_v43 = vld [vmem:[%s8162_s2 + $0x46c] ss:$16 sps:$4 sm:$0xff]  }
  0xc7   :  { %1968 = vmatpush1.bf16.msra.mxu0 %v5517_v18  ;;  %v5601_v18 = vld [vmem:[%s8162_s2 + $0x508] ss:$16 sps:$4 sm:$0xff]  }
  0xc8   :  { %2021 = vmatpush1.bf16.msra.mxu1 %v5520_v53  ;;  %1969 = vmatprep.subr.bf16.mxu0 %v5525_v54  ;;  %v5604_v53 = vld [vmem:[%s8162_s2 + $0x708] ss:$16 sps:$4 sm:$0xff]   ;;  %v7074_v54 = vsub.s32 0, %v7059_v15 }
  0xc9   :  { %2022 = vmatprep.subr.bf16.mxu1 %v5528_v19  ;;  %v7079_v19 = vld [vmem:[%s8166_s3] sm:$0xf] }
  0xca   :  { %1902 = vmatmul.mubr.bf16.gmra.mxu0 %v6466_v42  ;;  %v5543_v42 = vld [vmem:[%s8162_s2 + $0x44c] ss:$16 sps:$4 sm:$0xff]  }
  0xcb   :  { %1955 = vmatmul.mubr.bf16.gmra.mxu1 %v6488_v49  ;;  %1970 = vmatpush1.bf16.msra.mxu0 %v5523_v12  ;;  %v5546_v49 = vld [vmem:[%s8162_s2 + $0x64c] ss:$16 sps:$4 sm:$0xff]   ;;  %v5609_v12 = vld [vmem:[%s8165_s5 + $0xe4] ss:$16 sps:$4 sm:$0xff]  }
  0xcc   :  { %2023 = vmatpush1.bf16.msra.mxu1 %v5526_v13  ;;  %1971 = vmatprep.subr.bf16.mxu0 %v5531_v20  ;;  %v7085_v13 = vsub.s32 1, %v7059_v15  ;;  %v7089_v20 = vrot.slane %v7079_v19, %v7074_v54 }
  0xcd   :  { %2024 = vmatprep.subr.bf16.mxu1 %v5534_v21  ;;  %1997 = vmatprep.mubr.bf16.mxu0 %v6524_v63  ;;  %v5544_v63 = vld [vmem:[%s8162_s2 + $0x648] ss:$16 sps:$4 sm:$0xff]   ;;  %v5607_v21 = vld [vmem:[%s8165_s5 + $0xe0] ss:$16 sps:$4 sm:$0xff]  }
  0xce   :  { %2050 = vmatprep.mubr.bf16.mxu1 %v6526_v0  ;;  %v5549_v0 = vld [vmem:[%s8162_s2 + $0x42c] ss:$16 sps:$4 sm:$0xff]  }
  0xcf   :  { %1972 = vmatpush1.bf16.msra.mxu0 %v5529_v22  ;;  %v7096_v22 = vrot.slane %v7079_v19, %v7085_v13 }
  0xd0   :  { %2025 = vmatpush1.bf16.msra.mxu1 %v5532_v37  ;;  %1973 = vmatprep.subr.bf16.mxu0 %v5537_v43  ;;  %v5612_v37 = vld [vmem:[%s8165_s5 + $0xc4] ss:$16 sps:$4 sm:$0xff]  }
  0xd1   :  { %2026 = vmatprep.subr.bf16.mxu1 %v5540_v23 }
  0xd3   :  { %1974 = vmatpush1.bf16.msra.mxu0 %v5535_v24 }
  0xd4   :  { %2027 = vmatpush1.bf16.msra.mxu1 %v5538_v25  ;;  %1975 = vmatprep.subr.bf16.mxu0 %v5543_v42 }
  0xd5   :  { %2028 = vmatprep.subr.bf16.mxu1 %v5546_v49  ;;  %v5610_v49 = vld [vmem:[%s8165_s5 + $0xc0] ss:$16 sps:$4 sm:$0xff]  }
  0xd7   :  { %1976 = vmatpush1.bf16.msra.mxu0 %v5541_v26 }
  0xd8   :  { %2029 = vmatpush1.bf16.msra.mxu1 %v5544_v63  ;;  %1977 = vmatprep.subr.bf16.mxu0 %v5549_v0 }
  0xd9   :  { %2030 = vmatprep.subr.bf16.mxu1 %v5552_v27 }
  0xdb   :  { %1978 = vmatpush1.bf16.msra.mxu0 %v5547_v28  ;;  %v5613_v28 = vld [vmem:[%s8165_s5 + $0xa0] ss:$16 sps:$4 sm:$0xff]  }
  0xdc   :  { %2031 = vmatpush1.bf16.msra.mxu1 %v5550_v29  ;;  %1979 = vmatprep.subr.bf16.mxu0 %v5555_v30 }
  0xdd   :  { %2032 = vmatprep.subr.bf16.mxu1 %v5558_v31  ;;  %v5618_v31 = vld [vmem:[%s8165_s5 + $0x84] ss:$16 sps:$4 sm:$0xff]  }
  0xdf   :  { %1980 = vmatpush1.bf16.msra.mxu0 %v5553_v32 }
  0xe0   :  { %2033 = vmatpush1.bf16.msra.mxu1 %v5556_v33  ;;  %1981 = vmatprep.subr.bf16.mxu0 %v5561_v34  ;;  %v5616_v34 = vld [vmem:[%s8165_s5 + $0x80] ss:$16 sps:$4 sm:$0xff]  }
  0xe1   :  { %2034 = vmatprep.subr.bf16.mxu1 %v5564_v35  ;;  %v5621_v35 = vld [vmem:[%s8165_s5 + $0x64] ss:$16 sps:$4 sm:$0xff]  }
  0xe3   :  { %1982 = vmatpush2.bf16.msra.mxu0 %v5559_v36  ;;  %v5619_v36 = vld [vmem:[%s8165_s5 + $0x60] ss:$16 sps:$4 sm:$0xff]  }
  0xe4   :  { %2035 = vmatpush2.bf16.msra.mxu1 %v5562_v38  ;;  %1983 = vmatprep.subr.bf16.mxu0 %v5567_v39  ;;  %v5627_v38 = vld [vmem:[%s8165_s5 + $0x24] ss:$16 sps:$4 sm:$0xff]   ;;  %v5625_v39 = vld [vmem:[%s8165_s5 + $0x20] ss:$16 sps:$4 sm:$0xff]  }
  0xe5   :  { %2036 = vmatprep.subr.bf16.mxu1 %v5570_v40  ;;  %v5703_v40 = vld [vmem:[%s8165_s5 + $0x2e0] ss:$16 sps:$4 sm:$0xff]  }
  0xe7   :  { %1984 = vmatpush2.bf16.msra.mxu0 %v5565_v41  ;;  %v5705_v41 = vld [vmem:[%s8165_s5 + $0x2e4] ss:$16 sps:$4 sm:$0xff]  }
  0xe8   :  { %2037 = vmatpush2.bf16.msra.mxu1 %v5568_v44  ;;  %1985 = vmatprep.subr.bf16.mxu0 %v5573_v45  ;;  %v5630_v44 = vld [vmem:[%s8165_s5 + $0x4] ss:$16 sps:$4 sm:$0xff]   ;;  %v5628_v45 = vld [vmem:[%s8165_s5] ss:$16 sps:$4 sm:$0xff]  }
  0xe9   :  { %2038 = vmatprep.subr.bf16.mxu1 %v5576_v46  ;;  %v5709_v46 = vld [vmem:[%s8165_s5 + $0x2c0] ss:$16 sps:$4 sm:$0xff]  }
  0xeb   :  { %1986 = vmatpush2.bf16.msra.mxu0 %v5571_v50  ;;  %v5711_v50 = vld [vmem:[%s8165_s5 + $0x2c4] ss:$16 sps:$4 sm:$0xff]  }
  0xec   :  { %2039 = vmatpush2.bf16.msra.mxu1 %v5574_v51  ;;  %1987 = vmatprep.subr.bf16.mxu0 %v5579_v52  ;;  %v5633_v51 = vld [vmem:[%s8165_s5 + $0x1e4] ss:$16 sps:$4 sm:$0xff]   ;;  %v5631_v52 = vld [vmem:[%s8165_s5 + $0x1e0] ss:$16 sps:$4 sm:$0xff]  }
  0xed   :  { %2040 = vmatprep.subr.bf16.mxu1 %v5582_v55  ;;  %v5715_v55 = vld [vmem:[%s8165_s5 + $0x2a0] ss:$16 sps:$4 sm:$0xff]  }
  0xef   :  { %1988 = vmatpush2.bf16.msra.mxu0 %v5577_v56  ;;  %v5717_v56 = vld [vmem:[%s8165_s5 + $0x2a4] ss:$16 sps:$4 sm:$0xff]  }
  0xf0   :  { %2041 = vmatpush2.bf16.msra.mxu1 %v5580_v57  ;;  %1989 = vmatprep.subr.bf16.mxu0 %v5585_v59  ;;  %v5636_v57 = vld [vmem:[%s8165_s5 + $0x1c4] ss:$16 sps:$4 sm:$0xff]   ;;  %v5634_v59 = vld [vmem:[%s8165_s5 + $0x1c0] ss:$16 sps:$4 sm:$0xff]  }
  0xf1   :  { %2042 = vmatprep.subr.bf16.mxu1 %v5588_v60  ;;  %v5721_v60 = vld [vmem:[%s8165_s5 + $0x280] ss:$16 sps:$4 sm:$0xff]  }
  0xf3   :  { %1990 = vmatpush2.bf16.msra.mxu0 %v5583_v62  ;;  %v5723_v62 = vld [vmem:[%s8165_s5 + $0x284] ss:$16 sps:$4 sm:$0xff]  }
  0xf4   :  { %2043 = vmatpush2.bf16.msra.mxu1 %v5586_v1  ;;  %1991 = vmatprep.subr.bf16.mxu0 %v5591_v2  ;;  %v5639_v1 = vld [vmem:[%s8165_s5 + $0x1a4] ss:$16 sps:$4 sm:$0xff]   ;;  %v5637_v2 = vld [vmem:[%s8165_s5 + $0x1a0] ss:$16 sps:$4 sm:$0xff]  }
  0xf5   :  { %2044 = vmatprep.subr.bf16.mxu1 %v5594_v3  ;;  %v5727_v3 = vld [vmem:[%s8165_s5 + $0x260] ss:$16 sps:$4 sm:$0xff]  }
  0xf7   :  { %1992 = vmatpush2.bf16.msra.mxu0 %v5589_v5  ;;  %v5729_v5 = vld [vmem:[%s8165_s5 + $0x264] ss:$16 sps:$4 sm:$0xff]  }
  0xf8   :  { %2045 = vmatpush2.bf16.msra.mxu1 %v5592_v6  ;;  %1993 = vmatprep.subr.bf16.mxu0 %v5597_v9  ;;  %v5642_v6 = vld [vmem:[%s8165_s5 + $0x184] ss:$16 sps:$4 sm:$0xff]   ;;  %v5733_v9 = vld [vmem:[%s8165_s5 + $0x240] ss:$16 sps:$4 sm:$0xff]  }
  0xf9   :  { %2046 = vmatprep.subr.bf16.mxu1 %v5600_v10  ;;  %v5735_v10 = vld [vmem:[%s8165_s5 + $0x244] ss:$16 sps:$4 sm:$0xff]  }
  0xfb   :  { %1994 = vmatpush2.bf16.msra.mxu0 %v5595_v11  ;;  %v5645_v11 = vld [vmem:[%s8165_s5 + $0x164] ss:$16 sps:$4 sm:$0xff]  }
  0xfc   :  { %2047 = vmatpush2.bf16.msra.mxu1 %v5598_v14  ;;  %1995 = vmatprep.subr.bf16.mxu0 %v5603_v16  ;;  %v5643_v14 = vld [vmem:[%s8165_s5 + $0x160] ss:$16 sps:$4 sm:$0xff]  }
  0xfd   :  { %2048 = vmatprep.subr.bf16.mxu1 %v5606_v17  ;;  %v5739_v16 = vld [vmem:[%s8165_s5 + $0x220] ss:$16 sps:$4 sm:$0xff]   ;;  %v5741_v17 = vld [vmem:[%s8165_s5 + $0x224] ss:$16 sps:$4 sm:$0xff]  }
  0xff   :  { %1996 = vmatpush2.bf16.msra.mxu0 %v5601_v18  ;;  %v5648_v18 = vld [vmem:[%s8165_s5 + $0x144] ss:$16 sps:$4 sm:$0xff]  }
 0x100   :  { %2049 = vmatpush2.bf16.msra.mxu1 %v5604_v53  ;;  %3023 = vmatprep.subr.bf16.mxu0 %v5609_v12 }
 0x101   :  { %3066 = vmatprep.subr.bf16.mxu1 %v5705_v41 }
 0x102   :  { %v1681_v43 = vpop.f32.mrf.mxu0  ;;  %1998 = vmatmul.mubr.bf16.vlgmr.msra.gmra.mxu0 %v6653_v47  ;;  %v5615_v47 = vld [vmem:[%s8165_s5 + $0xa4] ss:$16 sps:$4 sm:$0xff]  }
 0x103   :  { %v1734_v23 = vpop.f32.mrf.mxu1  ;;  %2051 = vmatmul.mubr.bf16.vlgmr.msra.gmra.mxu1 %v6655_v48  ;;  %v1682_v24 = vadd.f32 %v1681_v43, %v7089_v20  ;;  %2007 = vmatprep.mubr.bf16.mxu0 %v6675_v58  ;;  %v5747_v43 = vld [vmem:[%s8165_s5 + $0x204] ss:$16 sps:$4 sm:$0xff]  }
 0x104   :  { %2060 = vmatprep.mubr.bf16.mxu1 %v6683_v61  ;;  %v1683_v25 = vpop.f32.mrf.mxu0  ;;  %3024 = vmatpush1.bf16.msra.mxu0 %v5607_v21  ;;  %v5646_v21 = vld [vmem:[%s8165_s5 + $0x140] ss:$16 sps:$4 sm:$0xff]  }
 0x105   :  { %v1736_v42 = vpop.f32.mrf.mxu1  ;;  %v7109_v26 = vadd.f32 %v1734_v23, %v1682_v24  ;;  %v1684_v63 = vadd.f32 %v1683_v25, %v7096_v22  ;;  %3025 = vmatprep.subr.bf16.mxu0 %v5612_v37  ;;  %3067 = vmatpush1.bf16.msra.mxu1 %v5703_v40  ;;  %v5745_v37 = vld [vmem:[%s8165_s5 + $0x200] ss:$16 sps:$4 sm:$0xff]   ;;  %v5651_v23 = vld [vmem:[%s8165_s5 + $0x124] ss:$16 sps:$4 sm:$0xff]  }
 0x106   :  { %v1685_v48 = vpop.f32.mrf.mxu0  ;;  %3068 = vmatprep.subr.bf16.mxu1 %v5711_v50 }
 0x107   :  { %v1738_v58 = vpop.f32.mrf.mxu1  ;;  %v7115_v0 = vadd.f32 %v1736_v42, %v1684_v63  ;;  %v1686_v61 = vadd.f32 %v1685_v48, %v7089_v20  ;;  %v5649_v42 = vld [vmem:[%s8165_s5 + $0x120] ss:$16 sps:$4 sm:$0xff]   ;;  %v5753_v63 = vld [vmem:[%s8165_s5 + $0x3e4] ss:$16 sps:$4 sm:$0xff]  }
 0x108   :  { %v1687_v27 = vpop.f32.mrf.mxu0  ;;  %3026 = vmatpush1.bf16.msra.mxu0 %v5610_v49  ;;  %v5751_v49 = vld [vmem:[%s8165_s5 + $0x3e0] ss:$16 sps:$4 sm:$0xff]  }
 0x109   :  { %v7121_v29 = vadd.f32 %v1738_v58, %v1686_v61  ;;  %v1688_v30 = vadd.f32 %v1687_v27, %v7096_v22  ;;  %3027 = vmatprep.subr.bf16.mxu0 %v5615_v47  ;;  %v1740_v32 = vpop.f32.mrf.mxu1  ;;  %3069 = vmatpush1.bf16.msra.mxu1 %v5709_v46  ;;  %v5654_v47 = vld [vmem:[%s8165_s5 + $0x104] ss:$16 sps:$4 sm:$0xff]   ;;  %v5652_v61 = vld [vmem:[%s8165_s5 + $0x100] ss:$16 sps:$4 sm:$0xff]  }
 0x10a   :  { %2008 = vmatmul.mubr.bf16.gmra.mxu0 %v6701_v4  ;;  %v5624_v4 = vld [vmem:[%s8165_s5 + $0x44] ss:$16 sps:$4 sm:$0xff]   ;;  %3070 = vmatprep.subr.bf16.mxu1 %v5717_v56  ;;  %v1691_v53 = vpop.f32.mrf.mxu0  ;;  %v5757_v27 = vld [vmem:[%s8165_s5 + $0x3c0] ss:$16 sps:$4 sm:$0xff]  }
 0x10b   :  { %2061 = vmatmul.mubr.bf16.gmra.mxu1 %v6709_v7  ;;  %v7129_v33 = vadd.f32 %v1740_v32, %v1688_v30  ;;  %v5622_v7 = vld [vmem:[%s8165_s5 + $0x40] ss:$16 sps:$4 sm:$0xff]   ;;  %v1744_v12 = vpop.f32.mrf.mxu1  ;;  %v5657_v30 = vld [vmem:[%s8165_s5 + $0xec] ss:$16 sps:$4 sm:$0xff]   ;;  %v1692_v40 = vadd.f32 %v1691_v53, %v7089_v20 }
 0x10c   :  { %3028 = vmatpush1.bf16.msra.mxu0 %v5613_v28  ;;  %v1693_v24 = vpop.f32.mrf.mxu0  ;;  %v5759_v28 = vld [vmem:[%s8165_s5 + $0x3c4] ss:$16 sps:$4 sm:$0xff]  }
 0x10d   :  { %3029 = vmatprep.subr.bf16.mxu0 %v5618_v31  ;;  %3071 = vmatpush1.bf16.msra.mxu1 %v5715_v55  ;;  %v1746_v25 = vpop.f32.mrf.mxu1  ;;  %v5769_v55 = vld [vmem:[%s8165_s5 + $0x380] ss:$16 sps:$4 sm:$0xff]  }
 0x10e   :  { %3072 = vmatprep.subr.bf16.mxu1 %v5723_v62  ;;  %v1695_v48 = vpop.f32.mrf.mxu0 }
 0x10f   :  { %v1748_v58 = vpop.f32.mrf.mxu1  ;;  %v1696_v56 = vadd.f32 %v1695_v48, %v7089_v20 }
 0x110   :  { %3030 = vmatpush1.bf16.msra.mxu0 %v5616_v34  ;;  %v1697_v31 = vpop.f32.mrf.mxu0 }
 0x111   :  { %3031 = vmatprep.subr.bf16.mxu0 %v5621_v35  ;;  %3073 = vmatpush1.bf16.msra.mxu1 %v5721_v60  ;;  %v1750_v32 = vpop.f32.mrf.mxu1  ;;  %v1745_v60 = vadd.f32 %v1744_v12, %v1692_v40 }
 0x112   :  { %3074 = vmatprep.subr.bf16.mxu1 %v5729_v5 }
 0x114   :  { %3032 = vmatpush1.bf16.msra.mxu0 %v5619_v36  ;;  %v5765_v36 = vld [vmem:[%s8165_s5 + $0x3a4] ss:$16 sps:$4 sm:$0xff]  }
 0x115   :  { %3033 = vmatprep.subr.bf16.mxu0 %v5624_v4  ;;  %3075 = vmatpush1.bf16.msra.mxu1 %v5727_v3 }
 0x116   :  { %3076 = vmatprep.subr.bf16.mxu1 %v5735_v10  ;;  %v1749_v10 = vadd.f32 %v1748_v58, %v1696_v56  ;;  %v5661_v56 = vld [vmem:[%s8165_s5 + $0xa8] ss:$16 sps:$4 sm:$0xff]  }
 0x118   :  { %3034 = vmatpush1.bf16.msra.mxu0 %v5622_v7  ;;  %v5763_v7 = vld [vmem:[%s8165_s5 + $0x3a0] ss:$16 sps:$4 sm:$0xff]  }
 0x119   :  { %3035 = vmatprep.subr.bf16.mxu0 %v5627_v38  ;;  %3077 = vmatpush1.bf16.msra.mxu1 %v5733_v9  ;;  %v5775_v9 = vld [vmem:[%s8165_s5 + $0x360] ss:$16 sps:$4 sm:$0xff]  }
 0x11a   :  { %3078 = vmatprep.subr.bf16.mxu1 %v5741_v17 }
 0x11c   :  { %3036 = vmatpush1.bf16.msra.mxu0 %v5625_v39 }
 0x11d   :  { %3037 = vmatprep.subr.bf16.mxu0 %v5630_v44  ;;  %3079 = vmatpush1.bf16.msra.mxu1 %v5739_v16 }
 0x11e   :  { %3080 = vmatprep.subr.bf16.mxu1 %v5747_v43 }
 0x120   :  { %3038 = vmatpush1.bf16.msra.mxu0 %v5628_v45  ;;  %v1694_v45 = vadd.f32 %v1693_v24, %v7096_v22 }
 0x121   :  { %3039 = vmatprep.subr.bf16.mxu0 %v5633_v51  ;;  %3081 = vmatpush1.bf16.msra.mxu1 %v5745_v37 }
 0x122   :  { %3082 = vmatprep.subr.bf16.mxu1 %v5753_v63 }
 0x124   :  { %3040 = vmatpush2.bf16.msra.mxu0 %v5631_v52 }
 0x125   :  { %3041 = vmatprep.subr.bf16.mxu0 %v5636_v57  ;;  %3083 = vmatpush2.bf16.msra.mxu1 %v5751_v49  ;;  %v5781_v49 = vld [vmem:[%s8165_s5 + $0x340] ss:$16 sps:$4 sm:$0xff]  }
 0x126   :  { %3084 = vmatprep.subr.bf16.mxu1 %v5759_v28 }
 0x128   :  { %3042 = vmatpush2.bf16.msra.mxu0 %v5634_v59 }
 0x129   :  { %3043 = vmatprep.subr.bf16.mxu0 %v5639_v1  ;;  %3085 = vmatpush2.bf16.msra.mxu1 %v5757_v27  ;;  %v1747_v1 = vadd.f32 %v1746_v25, %v1694_v45 }
 0x12a   :  { %3086 = vmatprep.subr.bf16.mxu1 %v5765_v36 }
 0x12c   :  { %3044 = vmatpush2.bf16.msra.mxu0 %v5637_v2 }
 0x12d   :  { %3045 = vmatprep.subr.bf16.mxu0 %v5642_v6  ;;  %3087 = vmatpush2.bf16.msra.mxu1 %v5763_v7  ;;  %v1698_v6 = vadd.f32 %v1697_v31, %v7096_v22  ;;  %v5789_v31 = vld [vmem:[%s8165_s5 + $0x324] ss:$16 sps:$4 sm:$0xff]  }
 0x12f   :  { %v1751_v24 = vadd.f32 %v1750_v32, %v1698_v6  ;;  %v5681_v6 = vld [vmem:[%s8165_s5 + $0x1ec] ss:$16 sps:$4 sm:$0xff]  }
 0x130   :  { %3046 = vmatpush2.bf16.msra.mxu0 %v5640_v8 }
 0x131   :  { %3047 = vmatprep.subr.bf16.mxu0 %v5645_v11 }
 0x134   :  { %3048 = vmatpush2.bf16.msra.mxu0 %v5643_v14 }
 0x135   :  { %3049 = vmatprep.subr.bf16.mxu0 %v5648_v18 }
 0x138   :  { %3050 = vmatpush2.bf16.msra.mxu0 %v5646_v21 }
 0x139   :  { %3051 = vmatprep.subr.bf16.mxu0 %v5651_v23  ;;  %v5783_v23 = vld [vmem:[%s8165_s5 + $0x344] ss:$16 sps:$4 sm:$0xff]  }
 0x13c   :  { %3052 = vmatpush2.bf16.msra.mxu0 %v5649_v42 }
 0x13d   :  { %3053 = vmatprep.subr.bf16.mxu0 %v5654_v47 }
 0x140   :  { %3054 = vmatpush2.bf16.msra.mxu0 %v5652_v61 }
 0x141   :  { %3109 = vmatprep.subr.bf16.mxu0 %v5657_v30 }
 0x142   :  { %v1787_v34 = vpop.f32.mrf.mxu0 }
 0x143   :  { %v1840_v35 = vpop.f32.mrf.mxu1  ;;  %v1788_v4 = vadd.f32 %v1787_v34, %v7109_v26  ;;  %v5771_v26 = vld [vmem:[%s8165_s5 + $0x384] ss:$16 sps:$4 sm:$0xff]  }
 0x144   :  { %v1789_v38 = vpop.f32.mrf.mxu0  ;;  %3088 = vmatprep.subr.bf16.mxu1 %v5771_v26  ;;  %v5660_v26 = vld [vmem:[%s8165_s5 + $0xcc] ss:$16 sps:$4 sm:$0xff]  }
 0x145   :  { %v1842_v39 = vpop.f32.mrf.mxu1  ;;  %v1841_v41 = vadd.f32 %v1840_v35, %v1788_v4  ;;  %v1790_v44 = vadd.f32 %v1789_v38, %v7115_v0  ;;  %3089 = vmatpush2.bf16.msra.mxu1 %v5769_v55  ;;  %v5787_v35 = vld [vmem:[%s8165_s5 + $0x320] ss:$16 sps:$4 sm:$0xff]   ;;  %v5663_v55 = vld [vmem:[%s8165_s5 + $0xac] ss:$16 sps:$4 sm:$0xff]  }
 0x146   :  { %v1791_v46 = vpop.f32.mrf.mxu0  ;;  %v5793_v38 = vld [vmem:[%s8165_s5 + $0x300] ss:$16 sps:$4 sm:$0xff]  }
 0x147   :  { %v1844_v50 = vpop.f32.mrf.mxu1  ;;  %v1843_v51 = vadd.f32 %v1842_v39, %v1790_v44  ;;  %v1792_v52 = vadd.f32 %v1791_v46, %v7121_v29  ;;  %v2087_v57 = vmul.f32 0.01, %v1841_v41  ;;  %vm2071_vm0 = vcmp.gt.f32.partialorder %v1841_v41, 0.0  ;;  %v5777_v29 = vld [vmem:[%s8165_s5 + $0x364] ss:$16 sps:$4 sm:$0xff]  }
 0x148   :  { %v1793_v0 = vpop.f32.mrf.mxu0  ;;  %3090 = vmatprep.subr.bf16.mxu1 %v5777_v29  ;;  %v5795_v39 = vld [vmem:[%s8165_s5 + $0x304] ss:$16 sps:$4 sm:$0xff]   ;;  %v5655_v44 = vld [vmem:[%s8165_s5 + $0xe8] ss:$16 sps:$4 sm:$0xff]  }
 0x149   :  { %v1846_v59 = vpop.f32.mrf.mxu1  ;;  %v1845_v62 = vadd.f32 %v1844_v50, %v1792_v52  ;;  %v1794_v2 = vadd.f32 %v1793_v0, %v7129_v33  ;;  %v2103_v11 = vsel %vm2071_vm0, %v1841_v41, %v2087_v57  ;;  %vm2072_vm2 = vcmp.gt.f32.partialorder %v1843_v51, 0.0  ;;  %3091 = vmatpush2.bf16.msra.mxu1 %v5775_v9  ;;  %v5658_v52 = vld [vmem:[%s8165_s5 + $0xc8] ss:$16 sps:$4 sm:$0xff]   ;;  %v5666_v57 = vld [vmem:[%s8165_s5 + $0x8c] ss:$16 sps:$4 sm:$0xff]  }
 0x14a   :  { %v1797_v3 = vpop.f32.mrf.mxu0  ;;  %v2088_v17 = vmul.f32 0.01, %v1843_v51  ;;  %3092 = vmatprep.subr.bf16.mxu1 %v5783_v23  ;;  %v5664_v0 = vld [vmem:[%s8165_s5 + $0x88] ss:$16 sps:$4 sm:$0xff]   ;;  %v357_v9 = vsub.s32 2, %v7059_v15 }
 0x14b   :  { %v1850_v5 = vpop.f32.mrf.mxu1  ;;  %vm2075_vm1 = vcmp.gt.f32.partialorder %v1845_v62, 0.0  ;;  %v2091_v20 = vmul.f32 0.01, %v1845_v62  ;;  %v1798_v8 = vadd.f32 %v1797_v3, %v1745_v60  ;;  %v1847_v14 = vadd.f32 %v1846_v59, %v1794_v2  ;;  %v5669_v59 = vld [vmem:[%s8165_s5 + $0x6c] ss:$16 sps:$4 sm:$0xff]  }
 0x14c   :  { %v1799_v16 = vpop.f32.mrf.mxu0  ;;  %v2104_v61 = vsel %vm2072_vm2, %v1843_v51, %v2088_v17  ;;  %v5801_v51 = vld [vmem:[%s8165_s5 + $0x2ec] ss:$16 sps:$4 sm:$0xff]   ;;  %v5667_v60 = vld [vmem:[%s8165_s5 + $0x68] ss:$16 sps:$4 sm:$0xff]  }
 0x14d   :  { %v1852_v33 = vpop.f32.mrf.mxu1  ;;  %v2107_v18 = vsel %vm2075_vm1, %v1845_v62, %v2091_v20  ;;  %v1800_v53 = vadd.f32 %v1799_v16, %v1747_v1  ;;  %vm2076_vm3 = vcmp.gt.f32.partialorder %v1847_v14, 0.0  ;;  %v2092_v22 = vmul.f32 0.01, %v1847_v14  ;;  %3093 = vmatpush2.bf16.msra.mxu1 %v5781_v49  ;;  %v5672_v62 = vld [vmem:[%s8165_s5 + $0x4c] ss:$16 sps:$4 sm:$0xff]  }
 0x14e   :  { %v7295_v12 = vpack.c.bf16 %v2107_v18, %v2103_v11  ;;  %v1851_v21 = vadd.f32 %v1850_v5, %v1798_v8  ;;  %v1801_v37 = vpop.f32.mrf.mxu0  ;;  %3094 = vmatprep.subr.bf16.mxu1 %v5789_v31  ;;  %v5670_v1 = vld [vmem:[%s8165_s5 + $0x48] ss:$16 sps:$4 sm:$0xff]   ;;  %v5675_v2 = vld [vmem:[%s8165_s5 + $0x2c] ss:$16 sps:$4 sm:$0xff]   ;;  %v7390_v16 = vrot.slane %v7079_v19, %v357_v9 }
 0x14f   :  { %v1854_v43 = vpop.f32.mrf.mxu1  ;;  %v1802_v25 = vadd.f32 %v1801_v37, %v1749_v10  ;;  %v1853_v42 = vadd.f32 %v1852_v33, %v1800_v53  ;;  %v2108_v48 = vsel %vm2076_vm3, %v1847_v14, %v2092_v22  ;;  %v5673_v3 = vld [vmem:[%s8165_s5 + $0x28] ss:$16 sps:$4 sm:$0xff]   ;;  %v5678_v5 = vld [vmem:[%s8165_s5 + $0xc] ss:$16 sps:$4 sm:$0xff]   ;;  %v361_v14 = vsub.s32 3, %v7059_v15 }
 0x150   :  { %v1803_v63 = vpop.f32.mrf.mxu0  ;;  %vm2079_vm4 = vcmp.gt.f32.partialorder %v1851_v21, 0.0  ;;  %v2095_v27 = vmul.f32 0.01, %v1851_v21  ;;  %v7304_v30 = vpack.c.bf16 %v2108_v48, %v2104_v61  ;;  %v5676_v29 = vld [vmem:[%s8165_s5 + $0x8] ss:$16 sps:$4 sm:$0xff]  }
 0x151   :  { %v1856_v47 = vpop.f32.mrf.mxu1  ;;  %v1804_v58 = vadd.f32 %v1803_v63, %v1751_v24  ;;  %v1855_v28 = vadd.f32 %v1854_v43, %v1802_v25  ;;  %vm2080_vm5 = vcmp.gt.f32.partialorder %v1853_v42, 0.0  ;;  %v2096_v32 = vmul.f32 0.01, %v1853_v42  ;;  %3095 = vmatpush2.bf16.msra.mxu1 %v5787_v35  ;;  %v5679_v20 = vld [vmem:[%s8165_s5 + $0x1e8] ss:$16 sps:$4 sm:$0xff]  }
 0x152   :  { %v2111_v45 = vsel %vm2079_vm4, %v1851_v21, %v2095_v27  ;;  %3096 = vmatprep.subr.bf16.mxu1 %v5795_v39  ;;  %v5684_v8 = vld [vmem:[%s8165_s5 + $0x1cc] ss:$16 sps:$4 sm:$0xff]   ;;  %v5682_v10 = vld [vmem:[%s8165_s5 + $0x1c8] ss:$16 sps:$4 sm:$0xff]   ;;  %v7398_v17 = vrot.slane %v7079_v19, %v361_v14  ;;  %v5706_v39 = vld [vmem:[%s8167_s4 + $0xe0] ss:$16 sps:$4 sm:$0xff]  }
 0x153   :  { %v1857_v34 = vadd.f32 %v1856_v47, %v1804_v58  ;;  %vm2083_vm6 = vcmp.gt.f32.partialorder %v1855_v28, 0.0  ;;  %v2099_v36 = vmul.f32 0.01, %v1855_v28  ;;  %v2112_v40 = vsel %vm2080_vm5, %v1853_v42, %v2096_v32  ;;  %v5687_v11 = vld [vmem:[%s8165_s5 + $0x1ac] ss:$16 sps:$4 sm:$0xff]  }
 0x154   :  { %v5685_v33 = vld [vmem:[%s8165_s5 + $0x1a8] ss:$16 sps:$4 sm:$0xff]   ;;  %v5690_v18 = vld [vmem:[%s8165_s5 + $0x18c] ss:$16 sps:$4 sm:$0xff]  }
 0x155   :  { %vm2084_vm7 = vcmp.gt.f32.partialorder %v1857_v34, 0.0  ;;  %v2100_v4 = vmul.f32 0.01, %v1857_v34  ;;  %v2115_v7 = vsel %vm2083_vm6, %v1855_v28, %v2099_v36  ;;  %3097 = vmatpush2.bf16.msra.mxu1 %v5793_v38  ;;  %v5688_v23 = vld [vmem:[%s8165_s5 + $0x188] ss:$16 sps:$4 sm:$0xff]  }
 0x156   :  { %v7322_v50 = vpack.c.bf16 %v2115_v7, %v2111_v45  ;;  %3152 = vmatprep.subr.bf16.mxu1 %v5801_v51  ;;  %v5693_v25 = vld [vmem:[%s8165_s5 + $0x16c] ss:$16 sps:$4 sm:$0xff]   ;;  %v5691_v58 = vld [vmem:[%s8165_s5 + $0x168] ss:$16 sps:$4 sm:$0xff]   ;;  %v5708_v38 = vld [vmem:[%s8167_s4 + $0xe4] ss:$16 sps:$4 sm:$0xff]  }
 0x157   :  { %v2116_v41 = vsel %vm2084_vm7, %v1857_v34, %v2100_v4  ;;  %v5696_v28 = vld [vmem:[%s8165_s5 + $0x14c] ss:$16 sps:$4 sm:$0xff]   ;;  %v5694_v34 = vld [vmem:[%s8165_s5 + $0x148] ss:$16 sps:$4 sm:$0xff]   ;;  %v5718_v45 = vld [vmem:[%s8167_s4 + $0xa0] ss:$16 sps:$4 sm:$0xff]  }
 0x158   :  { %v2124_v46 = vpack.c.bf16 %v2116_v41, %v2112_v40  ;;  %v5699_v35 = vld [vmem:[%s8165_s5 + $0x12c] ss:$16 sps:$4 sm:$0xff]   ;;  %v5697_v36 = vld [vmem:[%s8165_s5 + $0x128] ss:$16 sps:$4 sm:$0xff]   ;;  %v5714_v40 = vld [vmem:[%s8167_s4 + $0xc4] ss:$16 sps:$4 sm:$0xff]  }
 0x159   :  { %v5702_v4 = vld [vmem:[%s8165_s5 + $0x10c] ss:$16 sps:$4 sm:$0xff]   ;;  %v5700_v7 = vld [vmem:[%s8165_s5 + $0x108] ss:$16 sps:$4 sm:$0xff]   ;;  %v5712_v41 = vld [vmem:[%s8167_s4 + $0xc0] ss:$16 sps:$4 sm:$0xff]  }
 0x15a   :  { %3055 = vmatprep.mubr.bf16.mxu0 %v2124_v46  ;;  %v5730_v51 = vld [vmem:[%s8167_s4 + $0x60] ss:$16 sps:$4 sm:$0xff]  }
 0x15b   :  { %3056 = vmatmul.mubr.bf16.vlgmr.msra.gmra.mxu0 %v7322_v50 }
 0x15c   :  { %3110 = vmatpush1.bf16.msra.mxu0 %v5655_v44  ;;  %3141 = vmatprep.mubr.bf16.mxu0 %v2124_v46  ;;  %v5720_v44 = vld [vmem:[%s8167_s4 + $0xa4] ss:$16 sps:$4 sm:$0xff]  }
 0x15d   :  { %3111 = vmatprep.subr.bf16.mxu0 %v5660_v26  ;;  %v5726_v46 = vld [vmem:[%s8167_s4 + $0x84] ss:$16 sps:$4 sm:$0xff]  }
 0x15e   :  { %v5732_v26 = vld [vmem:[%s8167_s4 + $0x64] ss:$16 sps:$4 sm:$0xff]  }
 0x160   :  { %3112 = vmatpush1.bf16.msra.mxu0 %v5658_v52  ;;  %v5738_v52 = vld [vmem:[%s8167_s4 + $0x44] ss:$16 sps:$4 sm:$0xff]  }
 0x161   :  { %3113 = vmatprep.subr.bf16.mxu0 %v5663_v55  ;;  %v5736_v55 = vld [vmem:[%s8167_s4 + $0x40] ss:$16 sps:$4 sm:$0xff]  }
 0x164   :  { %3114 = vmatpush1.bf16.msra.mxu0 %v5661_v56  ;;  %v5744_v56 = vld [vmem:[%s8167_s4 + $0x24] ss:$16 sps:$4 sm:$0xff]  }
 0x165   :  { %3115 = vmatprep.subr.bf16.mxu0 %v5666_v57  ;;  %v5742_v57 = vld [vmem:[%s8167_s4 + $0x20] ss:$16 sps:$4 sm:$0xff]  }
 0x168   :  { %3116 = vmatpush1.bf16.msra.mxu0 %v5664_v0  ;;  %v5750_v0 = vld [vmem:[%s8167_s4 + $0x4] ss:$16 sps:$4 sm:$0xff]  }
 0x169   :  { %3117 = vmatprep.subr.bf16.mxu0 %v5669_v59 }
 0x16c   :  { %3118 = vmatpush1.bf16.msra.mxu0 %v5667_v60 }
 0x16d   :  { %3119 = vmatprep.subr.bf16.mxu0 %v5672_v62  ;;  %v5748_v62 = vld [vmem:[%s8167_s4] ss:$16 sps:$4 sm:$0xff]  }
 0x170   :  { %3120 = vmatpush1.bf16.msra.mxu0 %v5670_v1  ;;  %v5756_v1 = vld [vmem:[%s8167_s4 + $0x1e4] ss:$16 sps:$4 sm:$0xff]  }
 0x171   :  { %3121 = vmatprep.subr.bf16.mxu0 %v5675_v2 }
 0x174   :  { %3122 = vmatpush1.bf16.msra.mxu0 %v5673_v3 }
 0x175   :  { %3123 = vmatprep.subr.bf16.mxu0 %v5678_v5  ;;  %v5754_v5 = vld [vmem:[%s8167_s4 + $0x1e0] ss:$16 sps:$4 sm:$0xff]  }
 0x178   :  { %3124 = vmatpush1.bf16.msra.mxu0 %v5676_v29  ;;  %v5762_v29 = vld [vmem:[%s8167_s4 + $0x1c4] ss:$16 sps:$4 sm:$0xff]  }
 0x179   :  { %3125 = vmatprep.subr.bf16.mxu0 %v5681_v6 }
 0x17c   :  { %3126 = vmatpush2.bf16.msra.mxu0 %v5679_v20 }
 0x17d   :  { %3127 = vmatprep.subr.bf16.mxu0 %v5684_v8  ;;  %v5760_v8 = vld [vmem:[%s8167_s4 + $0x1c0] ss:$16 sps:$4 sm:$0xff]  }
 0x180   :  { %3128 = vmatpush2.bf16.msra.mxu0 %v5682_v10  ;;  %v5768_v10 = vld [vmem:[%s8167_s4 + $0x1a4] ss:$16 sps:$4 sm:$0xff]  }
 0x181   :  { %3129 = vmatprep.subr.bf16.mxu0 %v5687_v11 }
 0x182   :  { %v1893_v53 = vpop.f32.mrf.mxu0 }
 0x183   :  { %v1946_v22 = vpop.f32.mrf.mxu1  ;;  %v1894_v21 = vadd.f32 %v1893_v53, %v7390_v16  ;;  %v5774_v53 = vld [vmem:[%s8167_s4 + $0x184] ss:$16 sps:$4 sm:$0xff]  }
 0x184   :  { %3130 = vmatpush2.bf16.msra.mxu0 %v5685_v33  ;;  %v1895_v37 = vpop.f32.mrf.mxu0 }
 0x185   :  { %v1948_v43 = vpop.f32.mrf.mxu1  ;;  %v7407_v24 = vadd.f32 %v1946_v22, %v1894_v21  ;;  %v1896_v19 = vadd.f32 %v1895_v37, %v7398_v17  ;;  %3131 = vmatprep.subr.bf16.mxu0 %v5690_v18  ;;  %v5766_v18 = vld [vmem:[%s8167_s4 + $0x1a0] ss:$16 sps:$4 sm:$0xff]  }
 0x186   :  { %v1897_v42 = vpop.f32.mrf.mxu0 }
 0x187   :  { %v1950_v49 = vpop.f32.mrf.mxu1  ;;  %v7413_v63 = vadd.f32 %v1948_v43, %v1896_v19  ;;  %v1898_v47 = vadd.f32 %v1897_v42, %v7390_v16  ;;  %v5772_v19 = vld [vmem:[%s8167_s4 + $0x180] ss:$16 sps:$4 sm:$0xff]  }
 0x188   :  { %3132 = vmatpush2.bf16.msra.mxu0 %v5688_v23  ;;  %v1899_v48 = vpop.f32.mrf.mxu0 }
 0x189   :  { %v7419_v61 = vadd.f32 %v1950_v49, %v1898_v47  ;;  %v1900_v27 = vadd.f32 %v1899_v48, %v7398_v17  ;;  %3133 = vmatprep.subr.bf16.mxu0 %v5693_v25  ;;  %v1952_v31 = vpop.f32.mrf.mxu1  ;;  %v5780_v49 = vld [vmem:[%s8167_s4 + $0x164] ss:$16 sps:$4 sm:$0xff]  }
 0x18a   :  { %v1903_v59 = vpop.f32.mrf.mxu0 }
 0x18b   :  { %v7425_v32 = vadd.f32 %v1952_v31, %v1900_v27  ;;  %v1956_v60 = vpop.f32.mrf.mxu1 }
 0x18c   :  { %3134 = vmatpush2.bf16.msra.mxu0 %v5691_v58  ;;  %v1905_v2 = vpop.f32.mrf.mxu0  ;;  %v1904_v58 = vadd.f32 %v1903_v59, %v7390_v16 }
 0x18d   :  { %3135 = vmatprep.subr.bf16.mxu0 %v5696_v28  ;;  %v1958_v3 = vpop.f32.mrf.mxu1 }
 0x18e   :  { %v1907_v6 = vpop.f32.mrf.mxu0 }
 0x18f   :  { %v1960_v20 = vpop.f32.mrf.mxu1  ;;  %v1908_v31 = vadd.f32 %v1907_v6, %v7390_v16  ;;  %v1957_v16 = vadd.f32 %v1956_v60, %v1904_v58 }
 0x190   :  { %3136 = vmatpush2.bf16.msra.mxu0 %v5694_v34  ;;  %v1909_v11 = vpop.f32.mrf.mxu0 }
 0x191   :  { %3137 = vmatprep.subr.bf16.mxu0 %v5699_v35  ;;  %v1962_v33 = vpop.f32.mrf.mxu1 }
 0x194   :  { %3138 = vmatpush2.bf16.msra.mxu0 %v5697_v36  ;;  %v5778_v36 = vld [vmem:[%s8167_s4 + $0x160] ss:$16 sps:$4 sm:$0xff]  }
 0x195   :  { %3139 = vmatprep.subr.bf16.mxu0 %v5702_v4 }
 0x198   :  { %3140 = vmatpush2.bf16.msra.mxu0 %v5700_v7  ;;  %v5786_v7 = vld [vmem:[%s8167_s4 + $0x144] ss:$16 sps:$4 sm:$0xff]  }
 0x199   :  { %3835 = vmatprep.subr.bf16.mxu0 %v5708_v38 }
 0x19b   :  { %3142 = vmatmul.mubr.bf16.vlgmr.msra.gmra.mxu0 %v7322_v50  ;;  %v5724_v50 = vld [vmem:[%s8167_s4 + $0x80] ss:$16 sps:$4 sm:$0xff]  }
 0x19c   :  { %3836 = vmatpush1.bf16.msra.mxu0 %v5706_v39  ;;  %3867 = vmatprep.mubr.bf16.mxu0 %v7304_v30 }
 0x19d   :  { %3837 = vmatprep.subr.bf16.mxu0 %v5714_v40 }
 0x1a0   :  { %3838 = vmatpush1.bf16.msra.mxu0 %v5712_v41 }
 0x1a1   :  { %3839 = vmatprep.subr.bf16.mxu0 %v5720_v44  ;;  %v1910_v44 = vadd.f32 %v1909_v11, %v7398_v17 }
 0x1a4   :  { %3840 = vmatpush1.bf16.msra.mxu0 %v5718_v45  ;;  %v1961_v45 = vadd.f32 %v1960_v20, %v1908_v31  ;;  %v5807_v31 = vld [vmem:[%s8165_s5 + $0x2cc] ss:$16 sps:$4 sm:$0xff]  }
 0x1a5   :  { %3841 = vmatprep.subr.bf16.mxu0 %v5726_v46 }
 0x1a8   :  { %3842 = vmatpush1.bf16.msra.mxu0 %v5724_v50 }
 0x1a9   :  { %3843 = vmatprep.subr.bf16.mxu0 %v5732_v26 }
 0x1ac   :  { %3844 = vmatpush1.bf16.msra.mxu0 %v5730_v51 }
 0x1ad   :  { %3845 = vmatprep.subr.bf16.mxu0 %v5738_v52  ;;  %v5784_v52 = vld [vmem:[%s8167_s4 + $0x140] ss:$16 sps:$4 sm:$0xff]  }
 0x1b0   :  { %3846 = vmatpush1.bf16.msra.mxu0 %v5736_v55 }
 0x1b1   :  { %3847 = vmatprep.subr.bf16.mxu0 %v5744_v56 }
 0x1b4   :  { %3848 = vmatpush1.bf16.msra.mxu0 %v5742_v57 }
 0x1b5   :  { %3849 = vmatprep.subr.bf16.mxu0 %v5750_v0  ;;  %v5792_v0 = vld [vmem:[%s8167_s4 + $0x124] ss:$16 sps:$4 sm:$0xff]  }
 0x1b8   :  { %3850 = vmatpush1.bf16.msra.mxu0 %v5748_v62 }
 0x1b9   :  { %3851 = vmatprep.subr.bf16.mxu0 %v5756_v1 }
 0x1bc   :  { %3852 = vmatpush2.bf16.msra.mxu0 %v5754_v5 }
 0x1bd   :  { %3853 = vmatprep.subr.bf16.mxu0 %v5762_v29  ;;  %v5790_v29 = vld [vmem:[%s8167_s4 + $0x120] ss:$16 sps:$4 sm:$0xff]  }
 0x1c0   :  { %3854 = vmatpush2.bf16.msra.mxu0 %v5760_v8 }
 0x1c1   :  { %3855 = vmatprep.subr.bf16.mxu0 %v5768_v10  ;;  %v5798_v10 = vld [vmem:[%s8167_s4 + $0x104] ss:$16 sps:$4 sm:$0xff]  }
 0x1c2   :  { %v1999_v22 = vpop.f32.mrf.mxu0 }
 0x1c3   :  { %v2052_v21 = vpop.f32.mrf.mxu1  ;;  %v2000_v37 = vadd.f32 %v1999_v22, %v7407_v24  ;;  %v1906_v24 = vadd.f32 %v1905_v2, %v7398_v17  ;;  %v1963_v2 = vadd.f32 %v1962_v33, %v1910_v44  ;;  %v5826_v44 = vld [vmem:[%s8167_s4 + $0x68] ss:$16 sps:$4 sm:$0xff]  }
 0x1c4   :  { %3856 = vmatpush2.bf16.msra.mxu0 %v5766_v18  ;;  %v2001_v43 = vpop.f32.mrf.mxu0 }
 0x1c5   :  { %v2054_v23 = vpop.f32.mrf.mxu1  ;;  %v2053_v25 = vadd.f32 %v2052_v21, %v2000_v37  ;;  %v2002_v42 = vadd.f32 %v2001_v43, %v7413_v63  ;;  %3857 = vmatprep.subr.bf16.mxu0 %v5774_v53  ;;  %v1959_v40 = vadd.f32 %v1958_v3, %v1906_v24  ;;  %v5796_v43 = vld [vmem:[%s8167_s4 + $0x100] ss:$16 sps:$4 sm:$0xff]  }
 0x1c6   :  { %v2003_v47 = vpop.f32.mrf.mxu0 }
 0x1c7   :  { %v2056_v48 = vpop.f32.mrf.mxu1  ;;  %v2055_v27 = vadd.f32 %v2054_v23, %v2002_v42  ;;  %v2004_v28 = vadd.f32 %v2003_v47, %v7419_v61  ;;  %v2089_v34 = vmul.f32 0.01, %v2053_v25  ;;  %vm2073_vm8 = vcmp.gt.f32.partialorder %v2053_v25, 0.0 }
 0x1c8   :  { %3858 = vmatpush2.bf16.msra.mxu0 %v5772_v19  ;;  %v2005_v35 = vpop.f32.mrf.mxu0  ;;  %v5804_v19 = vld [vmem:[%s8167_s4 + $0xec] ss:$16 sps:$4 sm:$0xff]  }
 0x1c9   :  { %v2058_v63 = vpop.f32.mrf.mxu1  ;;  %v2057_v4 = vadd.f32 %v2056_v48, %v2004_v28  ;;  %3859 = vmatprep.subr.bf16.mxu0 %v5780_v49  ;;  %v2006_v38 = vadd.f32 %v2005_v35, %v7425_v32  ;;  %v2105_v46 = vsel %vm2073_vm8, %v2053_v25, %v2089_v34  ;;  %v2090_v55 = vmul.f32 0.01, %v2055_v27  ;;  %v5802_v48 = vld [vmem:[%s8167_s4 + $0xe8] ss:$16 sps:$4 sm:$0xff]   ;;  %v5810_v34 = vld [vmem:[%s8167_s4 + $0xcc] ss:$16 sps:$4 sm:$0xff]  }
 0x1ca   :  { %v2009_v61 = vpop.f32.mrf.mxu0  ;;  %vm2074_vm10 = vcmp.gt.f32.partialorder %v2055_v27, 0.0  ;;  %v5808_v35 = vld [vmem:[%s8167_s4 + $0xc8] ss:$16 sps:$4 sm:$0xff]  }
 0x1cb   :  { %v2062_v39 = vpop.f32.mrf.mxu1  ;;  %vm2077_vm9 = vcmp.gt.f32.partialorder %v2057_v4, 0.0  ;;  %v2093_v41 = vmul.f32 0.01, %v2057_v4  ;;  %v2059_v50 = vadd.f32 %v2058_v63, %v2006_v38  ;;  %v2010_v56 = vadd.f32 %v2009_v61, %v1957_v16  ;;  %v5805_v63 = vld [vmem:[%s8165_s5 + $0x2c8] ss:$16 sps:$4 sm:$0xff]  }
 0x1cc   :  { %3860 = vmatpush2.bf16.msra.mxu0 %v5778_v36  ;;  %v2011_v26 = vpop.f32.mrf.mxu0  ;;  %v2106_v11 = vsel %vm2074_vm10, %v2055_v27, %v2090_v55  ;;  %v5799_v27 = vld [vmem:[%s8165_s5 + $0x2e8] ss:$16 sps:$4 sm:$0xff]   ;;  %v5816_v36 = vld [vmem:[%s8167_s4 + $0xac] ss:$16 sps:$4 sm:$0xff]  }
 0x1cd   :  { %v2064_v51 = vpop.f32.mrf.mxu1  ;;  %v2109_v32 = vsel %vm2077_vm9, %v2057_v4, %v2093_v41  ;;  %v2012_v57 = vadd.f32 %v2011_v26, %v1959_v40  ;;  %3861 = vmatprep.subr.bf16.mxu0 %v5786_v7  ;;  %vm2078_vm11 = vcmp.gt.f32.partialorder %v2059_v50, 0.0  ;;  %v2094_v59 = vmul.f32 0.01, %v2059_v50  ;;  %v5813_v4 = vld [vmem:[%s8165_s5 + $0x2ac] ss:$16 sps:$4 sm:$0xff]  }
 0x1ce   :  { %v7539_v17 = vpack.c.bf16 %v2109_v32, %v2105_v46  ;;  %v2013_v60 = vpop.f32.mrf.mxu0  ;;  %v2063_v20 = vadd.f32 %v2062_v39, %v2010_v56  ;;  %v5811_v7 = vld [vmem:[%s8165_s5 + $0x2a8] ss:$16 sps:$4 sm:$0xff]   ;;  %v5822_v38 = vld [vmem:[%s8167_s4 + $0x8c] ss:$16 sps:$4 sm:$0xff]  }
 0x1cf   :  { %v2014_v62 = vadd.f32 %v2013_v60, %v1961_v45  ;;  %v2066_v1 = vpop.f32.mrf.mxu1  ;;  %v2065_v3 = vadd.f32 %v2064_v51, %v2012_v57  ;;  %v2110_v6 = vsel %vm2078_vm11, %v2059_v50, %v2094_v59  ;;  %v5819_v61 = vld [vmem:[%s8165_s5 + $0x28c] ss:$16 sps:$4 sm:$0xff]   ;;  %v5820_v39 = vld [vmem:[%s8167_s4 + $0x88] ss:$16 sps:$4 sm:$0xff]  }
 0x1d0   :  { %3862 = vmatpush2.bf16.msra.mxu0 %v5784_v52  ;;  %v2015_v5 = vpop.f32.mrf.mxu0  ;;  %v7548_v53 = vpack.c.bf16 %v2110_v6, %v2106_v11  ;;  %v2097_v23 = vmul.f32 0.01, %v2063_v20  ;;  %vm2081_vm14 = vcmp.gt.f32.partialorder %v2063_v20, 0.0  ;;  %v5817_v16 = vld [vmem:[%s8165_s5 + $0x288] ss:$16 sps:$4 sm:$0xff]  }
 0x1d1   :  { %v2067_v8 = vadd.f32 %v2066_v1, %v2014_v62  ;;  %3863 = vmatprep.subr.bf16.mxu0 %v5792_v0  ;;  %v2016_v18 = vadd.f32 %v2015_v5, %v1963_v2  ;;  %v2068_v22 = vpop.f32.mrf.mxu1  ;;  %v2098_v21 = vmul.f32 0.01, %v2065_v3  ;;  %vm2082_vm13 = vcmp.gt.f32.partialorder %v2065_v3, 0.0  ;;  %v5828_v40 = vld [vmem:[%s8167_s4 + $0x6c] ss:$16 sps:$4 sm:$0xff]  }
 0x1d2   :  { %v2113_v58 = vsel %vm2081_vm14, %v2063_v20, %v2097_v23  ;;  %v5825_v41 = vld [vmem:[%s8165_s5 + $0x26c] ss:$16 sps:$4 sm:$0xff]   ;;  %v5823_v45 = vld [vmem:[%s8165_s5 + $0x268] ss:$16 sps:$4 sm:$0xff]  }
 0x1d3   :  { %v2101_v33 = vmul.f32 0.01, %v2067_v8  ;;  %vm2085_vm12 = vcmp.gt.f32.partialorder %v2067_v8, 0.0  ;;  %v2069_v37 = vadd.f32 %v2068_v22, %v2016_v18  ;;  %v2114_v49 = vsel %vm2082_vm13, %v2065_v3, %v2098_v21  ;;  %v5834_v46 = vld [vmem:[%s8167_s4 + $0x4c] ss:$16 sps:$4 sm:$0xff]  }
 0x1d4   :  { %3864 = vmatpush2.bf16.msra.mxu0 %v5790_v29  ;;  %v5831_v50 = vld [vmem:[%s8165_s5 + $0x24c] ss:$16 sps:$4 sm:$0xff]   ;;  %v5832_v26 = vld [vmem:[%s8167_s4 + $0x48] ss:$16 sps:$4 sm:$0xff]  }
 0x1d5   :  { %3865 = vmatprep.subr.bf16.mxu0 %v5798_v10  ;;  %vm2086_vm15 = vcmp.gt.f32.partialorder %v2069_v37, 0.0  ;;  %v2102_v25 = vmul.f32 0.01, %v2069_v37  ;;  %v2117_v42 = vsel %vm2085_vm12, %v2067_v8, %v2101_v33  ;;  %v5829_v51 = vld [vmem:[%s8165_s5 + $0x248] ss:$16 sps:$4 sm:$0xff]   ;;  %vm4637_vm12 = vcmask 122880  }
 0x1d6   :  { %v7562_v28 = vpack.c.bf16 %v2117_v42, %v2113_v58  ;;  %v5840_v52 = vld [vmem:[%s8167_s4 + $0x2c] ss:$16 sps:$4 sm:$0xff]   ;;  %v5838_v32 = vld [vmem:[%s8167_s4 + $0x28] ss:$16 sps:$4 sm:$0xff]  }
 0x1d7   :  { %v2118_v47 = vsel %vm2086_vm15, %v2069_v37, %v2102_v25  ;;  %v5837_v55 = vld [vmem:[%s8165_s5 + $0x22c] ss:$16 sps:$4 sm:$0xff]   ;;  %v5835_v56 = vld [vmem:[%s8165_s5 + $0x228] ss:$16 sps:$4 sm:$0xff]  }
 0x1d8   :  { %3866 = vmatpush2.bf16.msra.mxu0 %v5796_v43  ;;  %v2126_v24 = vpack.c.bf16 %v2118_v47, %v2114_v49  ;;  %v5846_v57 = vld [vmem:[%s8167_s4 + $0xc] ss:$16 sps:$4 sm:$0xff]   ;;  %v5844_v59 = vld [vmem:[%s8167_s4 + $0x8] ss:$16 sps:$4 sm:$0xff]  }
 0x1d9   :  { %3921 = vmatprep.subr.bf16.mxu0 %v5804_v19  ;;  %v5843_v0 = vld [vmem:[%s8165_s5 + $0x20c] ss:$16 sps:$4 sm:$0xff]   ;;  %v5841_v60 = vld [vmem:[%s8165_s5 + $0x208] ss:$16 sps:$4 sm:$0xff]  }
 0x1da   :  { %3098 = vmatprep.mubr.bf16.mxu1 %v2126_v24  ;;  %v5852_v62 = vld [vmem:[%s8167_s4 + $0x1ec] ss:$16 sps:$4 sm:$0xff]   ;;  %v5850_v2 = vld [vmem:[%s8167_s4 + $0x1e8] ss:$16 sps:$4 sm:$0xff]  }
 0x1db   :  { %3868 = vmatmul.mubr.bf16.vlgmr.msra.gmra.mxu0 %v7295_v12  ;;  %3099 = vmatmul.mubr.bf16.vlgmr.msra.gmra.mxu1 %v7562_v28  ;;  %v5849_v1 = vld [vmem:[%s8165_s5 + $0x3ec] ss:$16 sps:$4 sm:$0xff]   ;;  %v5847_v3 = vld [vmem:[%s8165_s5 + $0x3e8] ss:$16 sps:$4 sm:$0xff]  }
 0x1dc   :  { %3922 = vmatpush1.bf16.msra.mxu0 %v5802_v48  ;;  %3153 = vmatpush1.bf16.msra.mxu1 %v5799_v27  ;;  %v5858_v5 = vld [vmem:[%s8167_s4 + $0x1cc] ss:$16 sps:$4 sm:$0xff]   ;;  %v5856_v6 = vld [vmem:[%s8167_s4 + $0x1c8] ss:$16 sps:$4 sm:$0xff]  }
 0x1dd   :  { %3953 = vmatprep.mubr.bf16.mxu0 %v7304_v30  ;;  %3184 = vmatprep.mubr.bf16.mxu1 %v2126_v24  ;;  %v5814_v30 = vld [vmem:[%s8167_s4 + $0xa8] ss:$16 sps:$4 sm:$0xff]   ;;  %v5855_v29 = vld [vmem:[%s8165_s5 + $0x3cc] ss:$16 sps:$4 sm:$0xff]  }
 0x1de   :  { %3154 = vmatprep.subr.bf16.mxu1 %v5807_v31  ;;  %3923 = vmatprep.subr.bf16.mxu0 %v5810_v34  ;;  %v5853_v20 = vld [vmem:[%s8165_s5 + $0x3c8] ss:$16 sps:$4 sm:$0xff]   ;;  %v5864_v8 = vld [vmem:[%s8167_s4 + $0x1ac] ss:$16 sps:$4 sm:$0xff]  }
 0x1df   :  { %v5861_v10 = vld [vmem:[%s8165_s5 + $0x3ac] ss:$16 sps:$4 sm:$0xff]   ;;  %v5862_v11 = vld [vmem:[%s8167_s4 + $0x1a8] ss:$16 sps:$4 sm:$0xff]  }
 0x1e0   :  { %3924 = vmatpush1.bf16.msra.mxu0 %v5808_v35  ;;  %3155 = vmatpush1.bf16.msra.mxu1 %v5805_v63  ;;  %v5859_v18 = vld [vmem:[%s8165_s5 + $0x3a8] ss:$16 sps:$4 sm:$0xff]   ;;  %v5870_v33 = vld [vmem:[%s8167_s4 + $0x18c] ss:$16 sps:$4 sm:$0xff]  }
 0x1e1   :  { %3925 = vmatprep.subr.bf16.mxu0 %v5816_v36  ;;  %3156 = vmatprep.subr.bf16.mxu1 %v5813_v4  ;;  %v5867_v22 = vld [vmem:[%s8165_s5 + $0x38c] ss:$16 sps:$4 sm:$0xff]   ;;  %v5868_v21 = vld [vmem:[%s8167_s4 + $0x188] ss:$16 sps:$4 sm:$0xff]   ;;  %v5897_v4 = vld [vmem:[%s8167_s4 + $0x2e4] ss:$16 sps:$4 sm:$0xff]  }
 0x1e2   :  { %v5865_v37 = vld [vmem:[%s8165_s5 + $0x388] ss:$16 sps:$4 sm:$0xff]   ;;  %v5876_v43 = vld [vmem:[%s8167_s4 + $0x16c] ss:$16 sps:$4 sm:$0xff]  }
 0x1e3   :  { %v5873_v23 = vld [vmem:[%s8165_s5 + $0x36c] ss:$16 sps:$4 sm:$0xff]   ;;  %v5874_v19 = vld [vmem:[%s8167_s4 + $0x168] ss:$16 sps:$4 sm:$0xff]  }
 0x1e4   :  { %3926 = vmatpush1.bf16.msra.mxu0 %v5814_v30  ;;  %3157 = vmatpush1.bf16.msra.mxu1 %v5811_v7  ;;  %v5871_v25 = vld [vmem:[%s8165_s5 + $0x368] ss:$16 sps:$4 sm:$0xff]   ;;  %v5882_v42 = vld [vmem:[%s8167_s4 + $0x14c] ss:$16 sps:$4 sm:$0xff]   ;;  %v5895_v30 = vld [vmem:[%s8167_s4 + $0x2e0] ss:$16 sps:$4 sm:$0xff]  }
 0x1e5   :  { %3927 = vmatprep.subr.bf16.mxu0 %v5822_v38  ;;  %3158 = vmatprep.subr.bf16.mxu1 %v5819_v61  ;;  %v5879_v49 = vld [vmem:[%s8165_s5 + $0x34c] ss:$16 sps:$4 sm:$0xff]   ;;  %v5880_v47 = vld [vmem:[%s8167_s4 + $0x148] ss:$16 sps:$4 sm:$0xff]   ;;  %v5900_v7 = vld [vmem:[%s8167_s4 + $0x2c4] ss:$16 sps:$4 sm:$0xff]  }
 0x1e6   :  { %v5877_v48 = vld [vmem:[%s8165_s5 + $0x348] ss:$16 sps:$4 sm:$0xff]   ;;  %v5888_v58 = vld [vmem:[%s8167_s4 + $0x12c] ss:$16 sps:$4 sm:$0xff]   ;;  %v5898_v38 = vld [vmem:[%s8167_s4 + $0x2c0] ss:$16 sps:$4 sm:$0xff]  }
 0x1e7   :  { %v5885_v24 = vld [vmem:[%s8165_s5 + $0x32c] ss:$16 sps:$4 sm:$0xff]   ;;  %v5886_v27 = vld [vmem:[%s8167_s4 + $0x128] ss:$16 sps:$4 sm:$0xff]   ;;  %v5903_v61 = vld [vmem:[%s8167_s4 + $0x2a4] ss:$16 sps:$4 sm:$0xff]  }
 0x1e8   :  { %3928 = vmatpush1.bf16.msra.mxu0 %v5820_v39  ;;  %3159 = vmatpush1.bf16.msra.mxu1 %v5817_v16  ;;  %v5883_v31 = vld [vmem:[%s8165_s5 + $0x328] ss:$16 sps:$4 sm:$0xff]   ;;  %v5894_v34 = vld [vmem:[%s8167_s4 + $0x10c] ss:$16 sps:$4 sm:$0xff]   ;;  %v5901_v39 = vld [vmem:[%s8167_s4 + $0x2a0] ss:$16 sps:$4 sm:$0xff]  }
 0x1e9   :  { %3929 = vmatprep.subr.bf16.mxu0 %v5828_v40  ;;  %3160 = vmatprep.subr.bf16.mxu1 %v5825_v41  ;;  %v5891_v35 = vld [vmem:[%s8165_s5 + $0x30c] ss:$16 sps:$4 sm:$0xff]   ;;  %v5892_v63 = vld [vmem:[%s8167_s4 + $0x108] ss:$16 sps:$4 sm:$0xff]   ;;  %v5909_v16 = vld [vmem:[%s8167_s4 + $0x264] ss:$16 sps:$4 sm:$0xff]  }
 0x1ea   :  { %v5889_v36 = vld [vmem:[%s8165_s5 + $0x308] ss:$16 sps:$4 sm:$0xff]   ;;  %v5907_v40 = vld [vmem:[%s8167_s4 + $0x260] ss:$16 sps:$4 sm:$0xff]   ;;  %v5912_v41 = vld [vmem:[%s8167_s4 + $0x244] ss:$16 sps:$4 sm:$0xff]  }
 0x1ec   :  { %3930 = vmatpush1.bf16.msra.mxu0 %v5826_v44  ;;  %3161 = vmatpush1.bf16.msra.mxu1 %v5823_v45  ;;  %v5910_v44 = vld [vmem:[%s8167_s4 + $0x240] ss:$16 sps:$4 sm:$0xff]   ;;  %v5915_v45 = vld [vmem:[%s8167_s4 + $0x224] ss:$16 sps:$4 sm:$0xff]  }
 0x1ed   :  { %3931 = vmatprep.subr.bf16.mxu0 %v5834_v46  ;;  %3162 = vmatprep.subr.bf16.mxu1 %v5831_v50  ;;  %v5913_v46 = vld [vmem:[%s8167_s4 + $0x220] ss:$16 sps:$4 sm:$0xff]   ;;  %v5918_v50 = vld [vmem:[%s8167_s4 + $0x204] ss:$16 sps:$4 sm:$0xff]  }
 0x1f0   :  { %3932 = vmatpush1.bf16.msra.mxu0 %v5832_v26  ;;  %3163 = vmatpush1.bf16.msra.mxu1 %v5829_v51  ;;  %v5916_v26 = vld [vmem:[%s8167_s4 + $0x200] ss:$16 sps:$4 sm:$0xff]   ;;  %v5921_v51 = vld [vmem:[%s8167_s4 + $0x3e4] ss:$16 sps:$4 sm:$0xff]  }
 0x1f1   :  { %3933 = vmatprep.subr.bf16.mxu0 %v5840_v52  ;;  %3164 = vmatprep.subr.bf16.mxu1 %v5837_v55  ;;  %v5919_v52 = vld [vmem:[%s8167_s4 + $0x3e0] ss:$16 sps:$4 sm:$0xff]   ;;  %v5924_v55 = vld [vmem:[%s8167_s4 + $0x3c4] ss:$16 sps:$4 sm:$0xff]  }
 0x1f4   :  { %3934 = vmatpush1.bf16.msra.mxu0 %v5838_v32  ;;  %3165 = vmatpush1.bf16.msra.mxu1 %v5835_v56  ;;  %v5922_v32 = vld [vmem:[%s8167_s4 + $0x3c0] ss:$16 sps:$4 sm:$0xff]   ;;  %v5927_v56 = vld [vmem:[%s8167_s4 + $0x3a4] ss:$16 sps:$4 sm:$0xff]  }
 0x1f5   :  { %3935 = vmatprep.subr.bf16.mxu0 %v5846_v57  ;;  %3166 = vmatprep.subr.bf16.mxu1 %v5843_v0  ;;  %v5925_v57 = vld [vmem:[%s8167_s4 + $0x3a0] ss:$16 sps:$4 sm:$0xff]   ;;  %v5930_v0 = vld [vmem:[%s8167_s4 + $0x384] ss:$16 sps:$4 sm:$0xff]  }
 0x1f8   :  { %3936 = vmatpush1.bf16.msra.mxu0 %v5844_v59  ;;  %3167 = vmatpush1.bf16.msra.mxu1 %v5841_v60  ;;  %v5928_v59 = vld [vmem:[%s8167_s4 + $0x380] ss:$16 sps:$4 sm:$0xff]   ;;  %v5933_v60 = vld [vmem:[%s8167_s4 + $0x364] ss:$16 sps:$4 sm:$0xff]  }
 0x1f9   :  { %3937 = vmatprep.subr.bf16.mxu0 %v5852_v62  ;;  %3168 = vmatprep.subr.bf16.mxu1 %v5849_v1  ;;  %v5931_v62 = vld [vmem:[%s8167_s4 + $0x360] ss:$16 sps:$4 sm:$0xff]   ;;  %v5936_v1 = vld [vmem:[%s8167_s4 + $0x344] ss:$16 sps:$4 sm:$0xff]  }
 0x1fc   :  { %3938 = vmatpush2.bf16.msra.mxu0 %v5850_v2  ;;  %3169 = vmatpush2.bf16.msra.mxu1 %v5847_v3  ;;  %v5934_v2 = vld [vmem:[%s8167_s4 + $0x340] ss:$16 sps:$4 sm:$0xff]   ;;  %v5939_v3 = vld [vmem:[%s8167_s4 + $0x324] ss:$16 sps:$4 sm:$0xff]  }
 0x1fd   :  { %3939 = vmatprep.subr.bf16.mxu0 %v5858_v5  ;;  %3170 = vmatprep.subr.bf16.mxu1 %v5855_v29  ;;  %v5937_v5 = vld [vmem:[%s8167_s4 + $0x320] ss:$16 sps:$4 sm:$0xff]   ;;  %v5942_v29 = vld [vmem:[%s8167_s4 + $0x304] ss:$16 sps:$4 sm:$0xff]  }
 0x200   :  { %3940 = vmatpush2.bf16.msra.mxu0 %v5856_v6  ;;  %3171 = vmatpush2.bf16.msra.mxu1 %v5853_v20  ;;  %v5940_v6 = vld [vmem:[%s8167_s4 + $0x300] ss:$16 sps:$4 sm:$0xff]   ;;  %v5945_v20 = vld [vmem:[%s8167_s4 + $0x2ec] ss:$16 sps:$4 sm:$0xff]  }
 0x201   :  { %3941 = vmatprep.subr.bf16.mxu0 %v5864_v8  ;;  %3172 = vmatprep.subr.bf16.mxu1 %v5861_v10  ;;  %v5943_v8 = vld [vmem:[%s8167_s4 + $0x2e8] ss:$16 sps:$4 sm:$0xff]   ;;  %v5948_v10 = vld [vmem:[%s8167_s4 + $0x2cc] ss:$16 sps:$4 sm:$0xff]  }
 0x204   :  { %3942 = vmatpush2.bf16.msra.mxu0 %v5862_v11  ;;  %3173 = vmatpush2.bf16.msra.mxu1 %v5859_v18  ;;  %v5946_v11 = vld [vmem:[%s8167_s4 + $0x2c8] ss:$16 sps:$4 sm:$0xff]   ;;  %v5951_v18 = vld [vmem:[%s8167_s4 + $0x2ac] ss:$16 sps:$4 sm:$0xff]  }
 0x205   :  { %3943 = vmatprep.subr.bf16.mxu0 %v5870_v33  ;;  %3174 = vmatprep.subr.bf16.mxu1 %v5867_v22  ;;  %v5949_v33 = vld [vmem:[%s8167_s4 + $0x2a8] ss:$16 sps:$4 sm:$0xff]   ;;  %v5954_v22 = vld [vmem:[%s8167_s4 + $0x28c] ss:$16 sps:$4 sm:$0xff]  }
 0x208   :  { %3944 = vmatpush2.bf16.msra.mxu0 %v5868_v21  ;;  %3175 = vmatpush2.bf16.msra.mxu1 %v5865_v37  ;;  %v5957_v21 = vld [vmem:[%s8167_s4 + $0x26c] ss:$16 sps:$4 sm:$0xff]   ;;  %v5991_v37 = vld [vmem:[%s8168_s7 + $0x70] ss:$8 sps:$4 sm:$0xff]  }
 0x209   :  { %3945 = vmatprep.subr.bf16.mxu0 %v5876_v43  ;;  %3176 = vmatprep.subr.bf16.mxu1 %v5873_v23  ;;  %v5993_v43 = vld [vmem:[%s8168_s7 + $0x74] ss:$8 sps:$4 sm:$0xff]   ;;  %v5996_v23 = vld [vmem:[%s8168_s7 + $0x64] ss:$8 sps:$4 sm:$0xff]  }
 0x20c   :  { %3946 = vmatpush2.bf16.msra.mxu0 %v5874_v19  ;;  %3177 = vmatpush2.bf16.msra.mxu1 %v5871_v25  ;;  %v5955_v19 = vld [vmem:[%s8167_s4 + $0x268] ss:$16 sps:$4 sm:$0xff]   ;;  %v5960_v25 = vld [vmem:[%s8167_s4 + $0x24c] ss:$16 sps:$4 sm:$0xff]  }
 0x20d   :  { %3947 = vmatprep.subr.bf16.mxu0 %v5882_v42  ;;  %3178 = vmatprep.subr.bf16.mxu1 %v5879_v49  ;;  %v5994_v42 = vld [vmem:[%s8168_s7 + $0x60] ss:$8 sps:$4 sm:$0xff]   ;;  %v5999_v49 = vld [vmem:[%s8168_s7 + $0x54] ss:$8 sps:$4 sm:$0xff]  }
 0x210   :  { %3948 = vmatpush2.bf16.msra.mxu0 %v5880_v47  ;;  %3179 = vmatpush2.bf16.msra.mxu1 %v5877_v48  ;;  %v5958_v47 = vld [vmem:[%s8167_s4 + $0x248] ss:$16 sps:$4 sm:$0xff]   ;;  %v5963_v48 = vld [vmem:[%s8167_s4 + $0x22c] ss:$16 sps:$4 sm:$0xff]  }
 0x211   :  { %3949 = vmatprep.subr.bf16.mxu0 %v5888_v58  ;;  %3180 = vmatprep.subr.bf16.mxu1 %v5885_v24  ;;  %v5997_v58 = vld [vmem:[%s8168_s7 + $0x50] ss:$8 sps:$4 sm:$0xff]   ;;  %v6002_v24 = vld [vmem:[%s8168_s7 + $0x44] ss:$8 sps:$4 sm:$0xff]  }
 0x214   :  { %3950 = vmatpush2.bf16.msra.mxu0 %v5886_v27  ;;  %3181 = vmatpush2.bf16.msra.mxu1 %v5883_v31  ;;  %v5961_v27 = vld [vmem:[%s8167_s4 + $0x228] ss:$16 sps:$4 sm:$0xff]   ;;  %v5966_v31 = vld [vmem:[%s8167_s4 + $0x20c] ss:$16 sps:$4 sm:$0xff]  }
 0x215   :  { %3951 = vmatprep.subr.bf16.mxu0 %v5894_v34  ;;  %3182 = vmatprep.subr.bf16.mxu1 %v5891_v35  ;;  %v6000_v34 = vld [vmem:[%s8168_s7 + $0x40] ss:$8 sps:$4 sm:$0xff]   ;;  %v6005_v35 = vld [vmem:[%s8168_s7 + $0x34] ss:$8 sps:$4 sm:$0xff]  }
 0x218   :  { %3952 = vmatpush2.bf16.msra.mxu0 %v5892_v63  ;;  %3183 = vmatpush2.bf16.msra.mxu1 %v5889_v36  ;;  %v5964_v63 = vld [vmem:[%s8167_s4 + $0x208] ss:$16 sps:$4 sm:$0xff]   ;;  %v5969_v36 = vld [vmem:[%s8167_s4 + $0x3ec] ss:$16 sps:$4 sm:$0xff]  }
 0x219   :  { %3878 = vmatprep.subr.bf16.mxu1 %v5897_v4  ;;  %4461 = vmatprep.subr.bf16.mxu0 %v5993_v43  ;;  %v6003_v4 = vld [vmem:[%s8168_s7 + $0x30] ss:$8 sps:$4 sm:$0xff]  }
 0x21a   :  { %v6045_v43 = vld [vmem:[%s8168_s7 + $0x150] ss:$8 sps:$4 sm:$0xff]  }
 0x21b   :  { %3954 = vmatmul.mubr.bf16.vlgmr.msra.gmra.mxu0 %v7295_v12  ;;  %3185 = vmatmul.mubr.bf16.vlgmr.msra.gmra.mxu1 %v7562_v28  ;;  %v5906_v12 = vld [vmem:[%s8167_s4 + $0x284] ss:$16 sps:$4 sm:$0xff]   ;;  %v5904_v28 = vld [vmem:[%s8167_s4 + $0x280] ss:$16 sps:$4 sm:$0xff]  }
 0x21c   :  { %3879 = vmatpush1.bf16.msra.mxu1 %v5895_v30  ;;  %3910 = vmatprep.mubr.bf16.mxu1 %v7548_v53  ;;  %v6008_v30 = vld [vmem:[%s8168_s7 + $0x24] ss:$8 sps:$4 sm:$0xff]  }
 0x21d   :  { %3880 = vmatprep.subr.bf16.mxu1 %v5900_v7  ;;  %4462 = vmatpush1.bf16.msra.mxu0 %v5991_v37  ;;  %v5967_v7 = vld [vmem:[%s8167_s4 + $0x3e8] ss:$16 sps:$4 sm:$0xff]   ;;  %v6047_v37 = vld [vmem:[%s8168_s7 + $0x154] ss:$8 sps:$4 sm:$0xff]  }
 0x21e   :  { %4463 = vmatprep.subr.bf16.mxu0 %v5996_v23  ;;  %v6050_v23 = vld [vmem:[%s8168_s7 + $0x144] ss:$8 sps:$4 sm:$0xff]  }
 0x220   :  { %3881 = vmatpush1.bf16.msra.mxu1 %v5898_v38  ;;  %v5972_v38 = vld [vmem:[%s8167_s4 + $0x3cc] ss:$16 sps:$4 sm:$0xff]  }
 0x221   :  { %3882 = vmatprep.subr.bf16.mxu1 %v5903_v61  ;;  %4464 = vmatpush1.bf16.msra.mxu0 %v5994_v42  ;;  %v6006_v61 = vld [vmem:[%s8168_s7 + $0x20] ss:$8 sps:$4 sm:$0xff]   ;;  %v6051_v42 = vld [vmem:[%s8168_s7 + $0x130] ss:$8 sps:$4 sm:$0xff]  }
 0x222   :  { %4465 = vmatprep.subr.bf16.mxu0 %v5999_v49  ;;  %v6056_v49 = vld [vmem:[%s8168_s7 + $0x124] ss:$8 sps:$4 sm:$0xff]  }
 0x224   :  { %3883 = vmatpush1.bf16.msra.mxu1 %v5901_v39  ;;  %v6011_v39 = vld [vmem:[%s8168_s7 + $0x14] ss:$8 sps:$4 sm:$0xff]  }
 0x225   :  { %3884 = vmatprep.subr.bf16.mxu1 %v5906_v12  ;;  %4466 = vmatpush1.bf16.msra.mxu0 %v5997_v58  ;;  %v5970_v12 = vld [vmem:[%s8167_s4 + $0x3c8] ss:$16 sps:$4 sm:$0xff]  }
 0x226   :  { %4467 = vmatprep.subr.bf16.mxu0 %v6002_v24  ;;  %v6057_v58 = vld [vmem:[%s8168_s7 + $0x110] ss:$8 sps:$4 sm:$0xff]   ;;  %v6062_v24 = vld [vmem:[%s8168_s7 + $0x104] ss:$8 sps:$4 sm:$0xff]  }
 0x228   :  { %3885 = vmatpush1.bf16.msra.mxu1 %v5904_v28  ;;  %v5975_v28 = vld [vmem:[%s8167_s4 + $0x3ac] ss:$16 sps:$4 sm:$0xff]  }
 0x229   :  { %3886 = vmatprep.subr.bf16.mxu1 %v5909_v16  ;;  %4468 = vmatpush1.bf16.msra.mxu0 %v6000_v34  ;;  %v6009_v16 = vld [vmem:[%s8168_s7 + $0x10] ss:$8 sps:$4 sm:$0xff]  }
 0x22a   :  { %4469 = vmatprep.subr.bf16.mxu0 %v6005_v35  ;;  %v6063_v34 = vld [vmem:[%s8168_s7 + $0x1f0] ss:$8 sps:$4 sm:$0xff]   ;;  %v6068_v35 = vld [vmem:[%s8168_s7 + $0x1e4] ss:$8 sps:$4 sm:$0xff]  }
 0x22c   :  { %3887 = vmatpush1.bf16.msra.mxu1 %v5907_v40  ;;  %v6014_v40 = vld [vmem:[%s8168_s7 + $0x4] ss:$8 sps:$4 sm:$0xff]  }
 0x22d   :  { %3888 = vmatprep.subr.bf16.mxu1 %v5912_v41  ;;  %4470 = vmatpush1.bf16.msra.mxu0 %v6003_v4  ;;  %v5973_v41 = vld [vmem:[%s8167_s4 + $0x3a8] ss:$16 sps:$4 sm:$0xff]  }
 0x22e   :  { %4471 = vmatprep.subr.bf16.mxu0 %v6008_v30  ;;  %v6069_v4 = vld [vmem:[%s8168_s7 + $0x1d0] ss:$8 sps:$4 sm:$0xff]   ;;  %v6074_v30 = vld [vmem:[%s8168_s7 + $0x1c4] ss:$8 sps:$4 sm:$0xff]  }
 0x230   :  { %3889 = vmatpush1.bf16.msra.mxu1 %v5910_v44  ;;  %v5978_v44 = vld [vmem:[%s8167_s4 + $0x38c] ss:$16 sps:$4 sm:$0xff]  }
 0x231   :  { %3890 = vmatprep.subr.bf16.mxu1 %v5915_v45  ;;  %4472 = vmatpush1.bf16.msra.mxu0 %v6006_v61  ;;  %v6012_v45 = vld [vmem:[%s8168_s7] ss:$8 sps:$4 sm:$0xff]   ;;  %v6075_v61 = vld [vmem:[%s8168_s7 + $0x1b0] ss:$8 sps:$4 sm:$0xff]  }
 0x232   :  { %4473 = vmatprep.subr.bf16.mxu0 %v6011_v39  ;;  %v6080_v39 = vld [vmem:[%s8168_s7 + $0x1a4] ss:$8 sps:$4 sm:$0xff]  }
 0x234   :  { %3891 = vmatpush1.bf16.msra.mxu1 %v5913_v46  ;;  %v6017_v46 = vld [vmem:[%s8168_s7 + $0xf4] ss:$8 sps:$4 sm:$0xff]  }
 0x235   :  { %3892 = vmatprep.subr.bf16.mxu1 %v5918_v50  ;;  %4474 = vmatpush1.bf16.msra.mxu0 %v6009_v16  ;;  %v5976_v50 = vld [vmem:[%s8167_s4 + $0x388] ss:$16 sps:$4 sm:$0xff]  }
 0x236   :  { %4475 = vmatprep.subr.bf16.mxu0 %v6014_v40  ;;  %v6081_v16 = vld [vmem:[%s8168_s7 + $0x190] ss:$8 sps:$4 sm:$0xff]   ;;  %v6084_v40 = vld [vmem:[%s8168_s7 + $0x180] ss:$8 sps:$4 sm:$0xff]  }
 0x238   :  { %3893 = vmatpush1.bf16.msra.mxu1 %v5916_v26  ;;  %v5981_v26 = vld [vmem:[%s8167_s4 + $0x36c] ss:$16 sps:$4 sm:$0xff]  }
 0x239   :  { %3894 = vmatprep.subr.bf16.mxu1 %v5921_v51  ;;  %4476 = vmatpush1.bf16.msra.mxu0 %v6012_v45  ;;  %v6015_v51 = vld [vmem:[%s8168_s7 + $0xf0] ss:$8 sps:$4 sm:$0xff]  }
 0x23a   :  { %4477 = vmatprep.subr.bf16.mxu0 %v6017_v46 }
 0x23c   :  { %3895 = vmatpush2.bf16.msra.mxu1 %v5919_v52  ;;  %v6020_v52 = vld [vmem:[%s8168_s7 + $0xe4] ss:$8 sps:$4 sm:$0xff]  }
 0x23d   :  { %3896 = vmatprep.subr.bf16.mxu1 %v5924_v55  ;;  %v5979_v55 = vld [vmem:[%s8167_s4 + $0x368] ss:$16 sps:$4 sm:$0xff]   ;;  %4478 = vmatpush2.bf16.msra.mxu0 %v6015_v51 }
 0x23e   :  { %4479 = vmatprep.subr.bf16.mxu0 %v6020_v52 }
 0x240   :  { %3897 = vmatpush2.bf16.msra.mxu1 %v5922_v32  ;;  %v5984_v32 = vld [vmem:[%s8167_s4 + $0x34c] ss:$16 sps:$4 sm:$0xff]  }
 0x241   :  { %3898 = vmatprep.subr.bf16.mxu1 %v5927_v56  ;;  %v6018_v56 = vld [vmem:[%s8168_s7 + $0xe0] ss:$8 sps:$4 sm:$0xff]  }
 0x242   :  { %4480 = vmatpush2.bf16.msra.mxu0 %v6018_v56 }
 0x244   :  { %3899 = vmatpush2.bf16.msra.mxu1 %v5925_v57  ;;  %v6023_v57 = vld [vmem:[%s8168_s7 + $0xd4] ss:$8 sps:$4 sm:$0xff]  }
 0x245   :  { %3900 = vmatprep.subr.bf16.mxu1 %v5930_v0  ;;  %v5982_v0 = vld [vmem:[%s8167_s4 + $0x348] ss:$16 sps:$4 sm:$0xff]   ;;  %4481 = vmatprep.subr.bf16.mxu0 %v6023_v57 }
 0x248   :  { %3901 = vmatpush2.bf16.msra.mxu1 %v5928_v59  ;;  %v5987_v59 = vld [vmem:[%s8167_s4 + $0x32c] ss:$16 sps:$4 sm:$0xff]  }
 0x249   :  { %3902 = vmatprep.subr.bf16.mxu1 %v5933_v60  ;;  %v6021_v60 = vld [vmem:[%s8168_s7 + $0xd0] ss:$8 sps:$4 sm:$0xff]  }
 0x24a   :  { %4482 = vmatpush2.bf16.msra.mxu0 %v6021_v60 }
 0x24c   :  { %3903 = vmatpush2.bf16.msra.mxu1 %v5931_v62  ;;  %v6026_v62 = vld [vmem:[%s8168_s7 + $0xc4] ss:$8 sps:$4 sm:$0xff]  }
 0x24d   :  { %3904 = vmatprep.subr.bf16.mxu1 %v5936_v1  ;;  %v5985_v1 = vld [vmem:[%s8167_s4 + $0x328] ss:$16 sps:$4 sm:$0xff]   ;;  %4483 = vmatprep.subr.bf16.mxu0 %v6026_v62 }
 0x250   :  { %3905 = vmatpush2.bf16.msra.mxu1 %v5934_v2  ;;  %v5990_v2 = vld [vmem:[%s8167_s4 + $0x30c] ss:$16 sps:$4 sm:$0xff]  }
 0x251   :  { %3906 = vmatprep.subr.bf16.mxu1 %v5939_v3  ;;  %v6024_v3 = vld [vmem:[%s8168_s7 + $0xc0] ss:$8 sps:$4 sm:$0xff]  }
 0x252   :  { %4484 = vmatpush2.bf16.msra.mxu0 %v6024_v3 }
 0x254   :  { %3907 = vmatpush2.bf16.msra.mxu1 %v5937_v5  ;;  %v5988_v5 = vld [vmem:[%s8167_s4 + $0x308] ss:$16 sps:$4 sm:$0xff]  }
 0x255   :  { %3908 = vmatprep.subr.bf16.mxu1 %v5942_v29  ;;  %v6029_v29 = vld [vmem:[%s8168_s7 + $0xb4] ss:$8 sps:$4 sm:$0xff]  }
 0x256   :  { %4485 = vmatprep.subr.bf16.mxu0 %v6029_v29 }
 0x258   :  { %3909 = vmatpush2.bf16.msra.mxu1 %v5940_v6  ;;  %v6027_v6 = vld [vmem:[%s8168_s7 + $0xb0] ss:$8 sps:$4 sm:$0xff]  }
 0x259   :  { %3964 = vmatprep.subr.bf16.mxu1 %v5945_v20  ;;  %4486 = vmatpush2.bf16.msra.mxu0 %v6027_v6  ;;  %v6032_v20 = vld [vmem:[%s8168_s7 + $0xa4] ss:$8 sps:$4 sm:$0xff]  }
 0x25a   :  { %4487 = vmatprep.subr.bf16.mxu0 %v6032_v20 }
 0x25b   :  { %3911 = vmatmul.mubr.bf16.vlgmr.msra.gmra.mxu1 %v7539_v17 }
 0x25c   :  { %3965 = vmatpush1.bf16.msra.mxu1 %v5943_v8  ;;  %3996 = vmatprep.mubr.bf16.mxu1 %v7548_v53  ;;  %v5952_v53 = vld [vmem:[%s8167_s4 + $0x288] ss:$16 sps:$4 sm:$0xff]  }
 0x25d   :  { %3966 = vmatprep.subr.bf16.mxu1 %v5948_v10  ;;  %v6030_v8 = vld [vmem:[%s8168_s7 + $0xa0] ss:$8 sps:$4 sm:$0xff]   ;;  %v6033_v10 = vld [vmem:[%s8168_s7 + $0x90] ss:$8 sps:$4 sm:$0xff]  }
 0x25e   :  { %4488 = vmatpush2.bf16.msra.mxu0 %v6030_v8  ;;  %v4007_v8 = vld [vmem:[%s8169_s6] sm:$0xf] }
 0x260   :  { %3967 = vmatpush1.bf16.msra.mxu1 %v5946_v11  ;;  %v6036_v11 = vld [vmem:[%s8168_s7 + $0x80] ss:$8 sps:$4 sm:$0xff]  }
 0x261   :  { %3968 = vmatprep.subr.bf16.mxu1 %v5951_v18  ;;  %v6038_v18 = vld [vmem:[%s8168_s7 + $0x84] ss:$8 sps:$4 sm:$0xff]  }
 0x264   :  { %3969 = vmatpush1.bf16.msra.mxu1 %v5949_v33  ;;  %v6041_v33 = vld [vmem:[%s8168_s7 + $0x174] ss:$8 sps:$4 sm:$0xff]  }
 0x265   :  { %3970 = vmatprep.subr.bf16.mxu1 %v5954_v22  ;;  %v6039_v22 = vld [vmem:[%s8168_s7 + $0x170] ss:$8 sps:$4 sm:$0xff]  }
 0x268   :  { %3971 = vmatpush1.bf16.msra.mxu1 %v5952_v53  ;;  %v6044_v53 = vld [vmem:[%s8168_s7 + $0x164] ss:$8 sps:$4 sm:$0xff]  }
 0x269   :  { %3972 = vmatprep.subr.bf16.mxu1 %v5957_v21  ;;  %v6042_v21 = vld [vmem:[%s8168_s7 + $0x160] ss:$8 sps:$4 sm:$0xff]  }
 0x26c   :  { %3973 = vmatpush1.bf16.msra.mxu1 %v5955_v19  ;;  %v6048_v19 = vld [vmem:[%s8168_s7 + $0x140] ss:$8 sps:$4 sm:$0xff]  }
 0x26d   :  { %3974 = vmatprep.subr.bf16.mxu1 %v5960_v25  ;;  %v6053_v25 = vld [vmem:[%s8168_s7 + $0x134] ss:$8 sps:$4 sm:$0xff]  }
 0x270   :  { %3975 = vmatpush1.bf16.msra.mxu1 %v5958_v47  ;;  %v6054_v47 = vld [vmem:[%s8168_s7 + $0x120] ss:$8 sps:$4 sm:$0xff]  }
 0x271   :  { %3976 = vmatprep.subr.bf16.mxu1 %v5963_v48  ;;  %v6059_v48 = vld [vmem:[%s8168_s7 + $0x114] ss:$8 sps:$4 sm:$0xff]  }
 0x274   :  { %3977 = vmatpush1.bf16.msra.mxu1 %v5961_v27  ;;  %v6060_v27 = vld [vmem:[%s8168_s7 + $0x100] ss:$8 sps:$4 sm:$0xff]  }
 0x275   :  { %3978 = vmatprep.subr.bf16.mxu1 %v5966_v31  ;;  %v6065_v31 = vld [vmem:[%s8168_s7 + $0x1f4] ss:$8 sps:$4 sm:$0xff]  }
 0x278   :  { %3979 = vmatpush1.bf16.msra.mxu1 %v5964_v63  ;;  %v6066_v63 = vld [vmem:[%s8168_s7 + $0x1e0] ss:$8 sps:$4 sm:$0xff]  }
 0x279   :  { %3980 = vmatprep.subr.bf16.mxu1 %v5969_v36  ;;  %v6071_v36 = vld [vmem:[%s8168_s7 + $0x1d4] ss:$8 sps:$4 sm:$0xff]  }
 0x27c   :  { %3981 = vmatpush2.bf16.msra.mxu1 %v5967_v7  ;;  %v6072_v7 = vld [vmem:[%s8168_s7 + $0x1c0] ss:$8 sps:$4 sm:$0xff]  }
 0x27d   :  { %3982 = vmatprep.subr.bf16.mxu1 %v5972_v38  ;;  %v6077_v38 = vld [vmem:[%s8168_s7 + $0x1b4] ss:$8 sps:$4 sm:$0xff]  }
 0x280   :  { %3983 = vmatpush2.bf16.msra.mxu1 %v5970_v12  ;;  %v6078_v12 = vld [vmem:[%s8168_s7 + $0x1a0] ss:$8 sps:$4 sm:$0xff]  }
 0x281   :  { %3984 = vmatprep.subr.bf16.mxu1 %v5975_v28  ;;  %v6083_v28 = vld [vmem:[%s8168_s7 + $0x194] ss:$8 sps:$4 sm:$0xff]  }
 0x284   :  { %3985 = vmatpush2.bf16.msra.mxu1 %v5973_v41  ;;  %v6086_v41 = vld [vmem:[%s8168_s7 + $0x184] ss:$8 sps:$4 sm:$0xff]  }
 0x285   :  { %3986 = vmatprep.subr.bf16.mxu1 %v5978_v44  ;;  %v3057_v44 = vpop.f32.mrf.mxu0 }
 0x287   :  { %v3059_v45 = vpop.f32.mrf.mxu0 }
 0x288   :  { %3987 = vmatpush2.bf16.msra.mxu1 %v5976_v50 }
 0x289   :  { %3988 = vmatprep.subr.bf16.mxu1 %v5981_v26  ;;  %v3061_v50 = vpop.f32.mrf.mxu0 }
 0x28b   :  { %v3063_v51 = vpop.f32.mrf.mxu0 }
 0x28c   :  { %3989 = vmatpush2.bf16.msra.mxu1 %v5979_v55 }
 0x28d   :  { %3990 = vmatprep.subr.bf16.mxu1 %v5984_v32  ;;  %v3143_v52 = vpop.f32.mrf.mxu0 }
 0x28f   :  { %v3145_v32 = vpop.f32.mrf.mxu0 }
 0x290   :  { %3991 = vmatpush2.bf16.msra.mxu1 %v5982_v0 }
 0x291   :  { %3992 = vmatprep.subr.bf16.mxu1 %v5987_v59  ;;  %v3147_v0 = vpop.f32.mrf.mxu0 }
 0x293   :  { %v3149_v60 = vpop.f32.mrf.mxu0 }
 0x294   :  { %3993 = vmatpush2.bf16.msra.mxu1 %v5985_v1 }
 0x295   :  { %3994 = vmatprep.subr.bf16.mxu1 %v5990_v2 }
 0x298   :  { %3995 = vmatpush2.bf16.msra.mxu1 %v5988_v5 }
 0x299   :  { %4504 = vmatprep.subr.bf16.mxu1 %v6041_v33 }
 0x29b   :  { %3997 = vmatmul.mubr.bf16.vlgmr.msra.gmra.mxu1 %v7539_v17  ;;  %v6035_v17 = vld [vmem:[%s8168_s7 + $0x94] ss:$8 sps:$4 sm:$0xff]   ;;  %v3100_v46 = vpop.f32.mrf.mxu1  ;;  %v3869_v62 = vpop.f32.mrf.mxu0 }
 0x29c   :  { %4489 = vmatprep.subr.bf16.mxu0 %v6035_v17  ;;  %4505 = vmatpush1.bf16.msra.mxu1 %v6039_v22  ;;  %v3101_v2 = vadd.f32 %v3100_v46, %v3057_v44  ;;  %v4016_v22 = vrot.slane %v4007_v8, %v7085_v13  ;;  %v4020_v44 = vrot.slane %v4007_v8, %v357_v9 }
 0x29d   :  { %4490 = vmatpush2.bf16.msra.mxu0 %v6033_v10  ;;  %4506 = vmatprep.subr.bf16.mxu1 %v6044_v53  ;;  %v3102_v26 = vpop.f32.mrf.mxu1  ;;  %v3871_v3 = vpop.f32.mrf.mxu0 }
 0x29e   :  { %4491 = vmatprep.subr.bf16.mxu0 %v6038_v18  ;;  %v3103_v5 = vadd.f32 %v3102_v26, %v3059_v45  ;;  %v3870_v10 = vadd.f32 %v3869_v62, %v3101_v2 }
 0x29f   :  { %v3104_v55 = vpop.f32.mrf.mxu1  ;;  %v3873_v17 = vpop.f32.mrf.mxu0 }
 0x2a0   :  { %4507 = vmatpush1.bf16.msra.mxu1 %v6042_v21  ;;  %v3105_v6 = vadd.f32 %v3104_v55, %v3061_v50  ;;  %v4012_v21 = vrot.slane %v4007_v8, %v7074_v54 }
 0x2a1   :  { %4492 = vmatpush2.bf16.msra.mxu0 %v6036_v11  ;;  %4508 = vmatprep.subr.bf16.mxu1 %v6047_v37  ;;  %v3106_v56 = vpop.f32.mrf.mxu1  ;;  %v3872_v11 = vadd.f32 %v3871_v3, %v3103_v5 }
 0x2a2   :  { %v3107_v18 = vadd.f32 %v3106_v56, %v3063_v51  ;;  %v4024_v56 = vrot.slane %v4007_v8, %v361_v14 }
 0x2a4   :  { %4509 = vmatpush1.bf16.msra.mxu1 %v6045_v43  ;;  %v3874_v43 = vadd.f32 %v3873_v17, %v3105_v6 }
 0x2a5   :  { %4510 = vmatprep.subr.bf16.mxu1 %v6050_v23 }
 0x2a8   :  { %4511 = vmatpush1.bf16.msra.mxu1 %v6048_v19  ;;  %v3875_v19 = vpop.f32.mrf.mxu0 }
 0x2a9   :  { %4512 = vmatprep.subr.bf16.mxu1 %v6053_v25 }
 0x2ac   :  { %4513 = vmatpush1.bf16.msra.mxu1 %v6051_v42 }
 0x2ad   :  { %4514 = vmatprep.subr.bf16.mxu1 %v6056_v49  ;;  %v3876_v49 = vadd.f32 %v3875_v19, %v3107_v18 }
 0x2b0   :  { %4515 = vmatpush1.bf16.msra.mxu1 %v6054_v47 }
 0x2b1   :  { %4516 = vmatprep.subr.bf16.mxu1 %v6059_v48 }
 0x2b4   :  { %4517 = vmatpush1.bf16.msra.mxu1 %v6057_v58 }
 0x2b5   :  { %4518 = vmatprep.subr.bf16.mxu1 %v6062_v24 }
 0x2b8   :  { %4519 = vmatpush1.bf16.msra.mxu1 %v6060_v27 }
 0x2b9   :  { %4520 = vmatprep.subr.bf16.mxu1 %v6065_v31 }
 0x2bc   :  { %4521 = vmatpush2.bf16.msra.mxu1 %v6063_v34 }
 0x2bd   :  { %4522 = vmatprep.subr.bf16.mxu1 %v6068_v35 }
 0x2c0   :  { %4523 = vmatpush2.bf16.msra.mxu1 %v6066_v63 }
 0x2c1   :  { %4524 = vmatprep.subr.bf16.mxu1 %v6071_v36 }
 0x2c4   :  { %4525 = vmatpush2.bf16.msra.mxu1 %v6069_v4 }
 0x2c5   :  { %4526 = vmatprep.subr.bf16.mxu1 %v6074_v30 }
 0x2c8   :  { %4527 = vmatpush2.bf16.msra.mxu1 %v6072_v7 }
 0x2c9   :  { %4528 = vmatprep.subr.bf16.mxu1 %v6077_v38 }
 0x2cc   :  { %4529 = vmatpush2.bf16.msra.mxu1 %v6075_v61 }
 0x2cd   :  { %4530 = vmatprep.subr.bf16.mxu1 %v6080_v39 }
 0x2d0   :  { %4531 = vmatpush2.bf16.msra.mxu1 %v6078_v12 }
 0x2d1   :  { %4532 = vmatprep.subr.bf16.mxu1 %v6083_v28 }
 0x2d4   :  { %4533 = vmatpush2.bf16.msra.mxu1 %v6081_v16 }
 0x2d5   :  { %4534 = vmatprep.subr.bf16.mxu1 %v6086_v41 }
 0x2d8   :  { %4535 = vmatpush2.bf16.msra.mxu1 %v6084_v40 }
 0x2db   :  { %v3186_v57 = vpop.f32.mrf.mxu1  ;;  %v3955_v39 = vpop.f32.mrf.mxu0 }
 0x2dc   :  { %v3187_v12 = vadd.f32 %v3186_v57, %v3143_v52 }
 0x2dd   :  { %v3188_v59 = vpop.f32.mrf.mxu1  ;;  %v3957_v16 = vpop.f32.mrf.mxu0 }
 0x2de   :  { %v3189_v28 = vadd.f32 %v3188_v59, %v3145_v32  ;;  %v3956_v40 = vadd.f32 %v3955_v39, %v3187_v12 }
 0x2df   :  { %v3190_v1 = vpop.f32.mrf.mxu1  ;;  %v3959_v50 = vpop.f32.mrf.mxu0 }
 0x2e0   :  { %v3191_v41 = vadd.f32 %v3190_v1, %v3147_v0  ;;  %v3958_v46 = vadd.f32 %v3957_v16, %v3189_v28 }
 0x2e1   :  { %v3192_v29 = vpop.f32.mrf.mxu1  ;;  %v3961_v32 = vpop.f32.mrf.mxu0 }
 0x2e2   :  { %v3193_v51 = vadd.f32 %v3192_v29, %v3149_v60  ;;  %v3960_v62 = vadd.f32 %v3959_v50, %v3191_v41 }
 0x2e4   :  { %v3962_v59 = vadd.f32 %v3961_v32, %v3193_v51 }
 0x31b   :  { %v3912_v20 = vpop.f32.mrf.mxu1 }
 0x31c   :  { %v3913_v53 = vadd.f32 %v3912_v20, %v3870_v10 }
 0x31d   :  { %v3914_v33 = vpop.f32.mrf.mxu1 }
 0x31e   :  { %v3915_v37 = vadd.f32 %v3914_v33, %v3872_v11  ;;  %v4029_v48 = vadd.f32 %v4012_v21, %v3913_v53 }
 0x31f   :  { %v3916_v23 = vpop.f32.mrf.mxu1 }
 0x320   :  { %v3917_v25 = vadd.f32 %v3916_v23, %v3874_v43  ;;  %v4030_v42 = vadd.f32 %v4016_v22, %v3915_v37  ;;  %v4045_v35 = vmul.f32 0.01, %v4029_v48  ;;  %vm4037_vm2 = vcmp.gt.f32.partialorder %v4029_v48, 0.0 }
 0x321   :  { %v3918_v47 = vpop.f32.mrf.mxu1  ;;  %v5219_v37 = vld.sshfl [vmem:[%s8170_s9] sm:$0x11 pattern:$0x75316420] }
 0x322   :  { %v4033_v58 = vadd.f32 %v4012_v21, %v3917_v25  ;;  %v3919_v24 = vadd.f32 %v3918_v47, %v3876_v49  ;;  %v4046_v31 = vmul.f32 0.01, %v4030_v42  ;;  %vm4038_vm1 = vcmp.gt.f32.partialorder %v4030_v42, 0.0 }
 0x323   :  { %v4053_v7 = vsel %vm4037_vm2, %v4029_v48, %v4045_v35  ;;  %v4580_v43 = vcombine.high %v5219_v37, %v5219_v37  ;;  %v16_v49 = vstv %s8171_s10 }
 0x324   :  { %v4049_v27 = vmul.f32 0.01, %v4033_v58  ;;  %vm4041_vm0 = vcmp.gt.f32.partialorder %v4033_v58, 0.0  ;;  %v4034_v34 = vadd.f32 %v4016_v22, %v3919_v24  ;;  %v4054_v4 = vsel %vm4038_vm1, %v4030_v42, %v4046_v31  ;;  %17 = vst [vmem:[#allocation2] sm:$0x1] %v16_v49 }
 0x325   :  { %v6087_v22 = vmov 1966171168   ;;  %v6088_v42 = vmov 0   ;;  %v4129_v24 = vld [vmem:[%s8172_s8] sm:$0x3] }
 0x326   :  { %vm4042_vm3 = vcmp.gt.f32.partialorder %v4034_v34, 0.0  ;;  %v4050_v63 = vmul.f32 0.01, %v4034_v34  ;;  %v4057_v36 = vsel %vm4041_vm0, %v4033_v58, %v4049_v27  ;;  %v4582_v53 = vunpack.c.l.s4 %v6087_v22  ;;  %5222 = vset.pattern.permute.xlu0 %v6088_v42 }
 0x327   :  { %v4061_v61 = vpack.c.bf16 %v4057_v36, %v4053_v7  ;;  %v4134_v27 = vrot.slane %v4129_v24, %v7074_v54 }
 0x328   :  { %v4058_v30 = vsel %vm4042_vm3, %v4034_v34, %v4050_v63  ;;  %v4583_v21 = vunpack.c.0.s8 %v4582_v53 }
 0x329   :  { %v4062_v38 = vpack.c.bf16 %v4058_v30, %v4054_v4 }
 0x32a   :  { %v4586_v23 = vsub.s32 %v4583_v21, %v7059_v15  ;;  %v4138_v15 = vrot.slane %v4129_v24, %v7085_v13 }
 0x32b   :  { %4493 = vmatprep.mubr.bf16.mxu0 %v4062_v38  ;;  %v4562_v47 = vld [vmem:[#allocation2] sm:$0x1] }
 0x32c   :  { %4494 = vmatmul.mubr.bf16.vlgmr.msra.gmra.mxu0 %v4061_v61  ;;  %v4594_v19 = vrot.slane %v4580_v43, %v4586_v23  ;;  %v4587_v25 = vrot.slane %v5219_v37, %v4586_v23  ;;  %4565 = vperm.xlu0 %5222, %v4562_v47  }
 0x32e   :  { %4629 = vmatprep.mubr.bf16.mxu0 %v4594_v19 }
 0x35b   :  { %v3998_v45 = vpop.f32.mrf.mxu1 }
 0x35c   :  { %v3999_v26 = vadd.f32 %v3998_v45, %v3956_v40 }
 0x35d   :  { %v4000_v55 = vpop.f32.mrf.mxu1 }
 0x35e   :  { %v4031_v2 = vadd.f32 %v4020_v44, %v3999_v26  ;;  %v4001_v3 = vadd.f32 %v4000_v55, %v3958_v46 }
 0x35f   :  { %v4002_v52 = vpop.f32.mrf.mxu1 }
 0x360   :  { %v4003_v57 = vadd.f32 %v4002_v52, %v3960_v62  ;;  %v4032_v0 = vadd.f32 %v4024_v56, %v4001_v3  ;;  %v4047_v5 = vmul.f32 0.01, %v4031_v2  ;;  %vm4039_vm4 = vcmp.gt.f32.partialorder %v4031_v2, 0.0 }
 0x361   :  { %v4004_v1 = vpop.f32.mrf.mxu1 }
 0x362   :  { %v4035_v9 = vadd.f32 %v4020_v44, %v4003_v57  ;;  %v4005_v6 = vadd.f32 %v4004_v1, %v3962_v59  ;;  %v4048_v60 = vmul.f32 0.01, %v4032_v0  ;;  %v4055_v17 = vsel %vm4039_vm4, %v4031_v2, %v4047_v5 }
 0x363   :  { %vm4040_vm6 = vcmp.gt.f32.partialorder %v4032_v0, 0.0 }
 0x364   :  { %vm4043_vm5 = vcmp.gt.f32.partialorder %v4035_v9, 0.0  ;;  %v4051_v20 = vmul.f32 0.01, %v4035_v9  ;;  %v4036_v29 = vadd.f32 %v4024_v56, %v4005_v6  ;;  %v4056_v11 = vsel %vm4040_vm6, %v4032_v0, %v4048_v60 }
 0x366   :  { %v4059_v14 = vsel %vm4043_vm5, %v4035_v9, %v4051_v20  ;;  %vm4044_vm7 = vcmp.gt.f32.partialorder %v4036_v29, 0.0  ;;  %v4052_v8 = vmul.f32 0.01, %v4036_v29 }
 0x367   :  { %v4063_v10 = vpack.c.bf16 %v4059_v14, %v4055_v17 }
 0x368   :  { %v4060_v18 = vsel %vm4044_vm7, %v4036_v29, %v4052_v8 }
 0x369   :  { %v4064_v33 = vpack.c.bf16 %v4060_v18, %v4056_v11 }
 0x36b   :  { %4536 = vmatprep.mubr.bf16.mxu1 %v4064_v33 }
 0x36c   :  { %4537 = vmatmul.mubr.bf16.vlgmr.msra.gmra.mxu1 %v4063_v10 }
 0x3a7   :  { %v4566_v56 = vpop.permute.xlu0 %4565 }
 0x3a8   :  { %v4571_v62 = vrot.slane %v4566_v56, %v7074_v54 }
 0x3ec   :  { %v4495_v48 = vpop.f32.mrf.mxu0 }
 0x3ed   :  { %v4496_v63 = vadd.f32 %v4495_v48, %v4134_v27 }
 0x3ee   :  { %v4497_v58 = vpop.f32.mrf.mxu0 }
 0x3ef   :  { %v4498_v35 = vadd.f32 %v4497_v58, %v4138_v15 }
 0x3f0   :  { %v4499_v31 = vpop.f32.mrf.mxu0 }
 0x3f1   :  { %v4500_v30 = vadd.f32 %v4499_v31, %v4134_v27 }
 0x3f2   :  { %v4501_v36 = vpop.f32.mrf.mxu0 }
 0x3f3   :  { %v4502_v39 = vadd.f32 %v4501_v36, %v4138_v15 }
 0x42c   :  { %v4538_v34 = vpop.f32.mrf.mxu1 }
 0x42d   :  { %v4539_v38 = vadd.f32 %v4538_v34, %v4496_v63 }
 0x42e   :  { %v4540_v4 = vpop.f32.mrf.mxu1 }
 0x42f   :  { %v4541_v7 = vadd.f32 %v4540_v4, %v4498_v35  ;;  %v4551_v13 = vmul.f32 0.01, %v4539_v38  ;;  %vm4547_vm10 = vcmp.gt.f32.partialorder %v4539_v38, 0.0 }
 0x430   :  { %v4542_v61 = vpop.f32.mrf.mxu1 }
 0x431   :  { %v4543_v12 = vadd.f32 %v4542_v61, %v4500_v30  ;;  %v4552_v16 = vmul.f32 0.01, %v4541_v7  ;;  %vm4548_vm9 = vcmp.gt.f32.partialorder %v4541_v7, 0.0  ;;  %v4555_v26 = vsel %vm4547_vm10, %v4539_v38, %v4551_v13 }
 0x432   :  { %v4544_v28 = vpop.f32.mrf.mxu1 }
 0x433   :  { %vm4549_vm8 = vcmp.gt.f32.partialorder %v4543_v12, 0.0  ;;  %v4553_v40 = vmul.f32 0.01, %v4543_v12  ;;  %v4545_v41 = vadd.f32 %v4544_v28, %v4502_v39  ;;  %v4556_v46 = vsel %vm4548_vm9, %v4541_v7, %v4552_v16 }
 0x435   :  { %vm4550_vm11 = vcmp.gt.f32.partialorder %v4545_v41, 0.0  ;;  %v4554_v44 = vmul.f32 0.01, %v4545_v41  ;;  %v4557_v45 = vsel %vm4549_vm8, %v4543_v12, %v4553_v40 }
 0x436   :  { %v4560_v55 = vpack.c.bf16 %v4557_v45, %v4555_v26 }
 0x437   :  { %v4558_v50 = vsel %vm4550_vm11, %v4545_v41, %v4554_v44 }
 0x438   :  { %v4561_v51 = vpack.c.bf16 %v4558_v50, %v4556_v46 }
 0x43a   :  { %4611 = vmatprep.subr.bf16.mxu0 %v4561_v51 }
 0x43b   :  { %4612 = vmatpush1.bf16.xpose.msra.mxu0 %v4560_v55 }
 0x442   :  { %4630 = vmatmul.mubr.bf16.vlgmr.msra.gmra.mxu0 %v4587_v25 }
 0x502   :  { %v4631_v2 = vpop.f32.mrf.mxu0 }
 0x503   :  { %v4632_v3 = vadd.f32 %v4631_v2, %v4571_v62 }
 0x504   :  { %v4633_v52 = vpop.f32.mrf.mxu0 }
 0x505   :  { %4638 = vst.msk [vmem:[%s8173_s11] sm:$0x1] %vm4637_vm12, %v4632_v3 }
 0x506   :  { %v4634_v32 = vpop.f32.mrf.mxu0 }
 0x508   :  { %v4635_v57 = vpop.f32.mrf.mxu0 }

</bundles_post_ra>
